<compile_context>
chip_gen: v6e
topology: v6e:2x2x1
jax: 0.10.0
libtpu: 0.0.40
codegen_flags: <defaults>
</compile_context>

<pallas_src>
import jax
import jax.numpy as jnp
from jax.experimental import pallas as pl
from jax.experimental.pallas import tpu as pltpu


# --------------------------------------------------------------------------- #
# Small helpers                                                               #
# --------------------------------------------------------------------------- #
def _round_up(x, m):
    return ((x + m - 1) // m) * m


def _pad2(x, rows, cols):
    r, c = x.shape
    if r == rows and c == cols:
        return x
    return jnp.pad(x, ((0, rows - r), (0, cols - c)))


def _cores_per_chip():
    """2 TensorCores per chip on v7x (and megacore v4 / v5p); otherwise 1."""
    try:
        kind = (jax.devices()[0].device_kind or "").lower()
    except Exception:
        return 1
    if any(tag in kind for tag in ("v7", "7x", "v4", "v5p")):
        return 2
    return 1


def _vmem_cap_bytes():
    """Generation-aware usable VMEM (physical capacity minus headroom)."""
    cap = None
    try:
        info = pltpu.get_tpu_info()
        for name in ("vmem_capacity_bytes", "vmem_size_bytes", "vmem_bytes"):
            v = getattr(info, name, None)
            if v:
                cap = int(v)
                break
    except Exception:
        cap = None
    if cap is None:
        cap = 64 * 1024 * 1024          # conservative fallback: v7x physical
    return max(cap - 8 * 1024 * 1024, 16 * 1024 * 1024)


def _divisor_tiles(n):
    """Divisors of n that are sublane friendly (mult. of 8) or n itself, desc."""
    return [t for t in range(n, 0, -1) if n % t == 0 and (t % 8 == 0 or t == n)]


def _pick_tm(n, want_splits, max_tile=512):
    """Largest divisor tile giving at least `want_splits` grid steps (if any)."""
    tiles = _divisor_tiles(n)
    for t in tiles:
        if t <= max_tile and n // t >= want_splits:
            return t
    for t in tiles:
        if n // t >= want_splits:
            return t
    return tiles[0]


def _estimate_vmem_bytes(tm, hp, cp, depth, fc_bias, return_features,
                         weight_buffers):
    """f32 VMEM footprint estimate (weights x weight_buffers, I/O x2)."""
    w_bytes = 4 * ((depth - 1) * hp * hp + hp * cp)
    b_bytes = 4 * cp if fc_bias else 0
    tile_elems = tm * hp + 2 * tm * cp + cp          # H, Y, out, partial-loss
    if return_features:
        tile_elems += (depth - 1) * tm * hp          # feature tiles
    return weight_buffers * (w_bytes + b_bytes) + 2 * 4 * tile_elems + (1 << 20)


# --------------------------------------------------------------------------- #
# Kernel                                                                      #
# --------------------------------------------------------------------------- #
def _make_kernel(depth, fc_bias, store_features, inv_2n):
    """Fused forward + per-tile partial data loss (fixed depth / bias config)."""

    def kernel(*refs):
        idx = 0
        h_ref = refs[idx]; idx += 1                          # (tm, hp)
        w_refs = refs[idx:idx + depth]; idx += depth         # (hp,hp)...(hp,cp)
        b_ref = None
        if fc_bias:
            b_ref = refs[idx]; idx += 1                      # (1, cp)
        y_ref = refs[idx]; idx += 1                          # (tm, cp)
        feat_refs = ()
        if store_features:
            feat_refs = refs[idx:idx + depth - 1]; idx += depth - 1
        out_ref = refs[idx]; idx += 1                        # (tm, cp)
        ploss_ref = refs[idx]                                # (1, 1, cp)

        # ---- linear chain on the MXU (weights pre-transposed to (in, out)) ----
        z = h_ref[...]
        for i in range(depth):
            z = jnp.dot(z, w_refs[i][...], preferred_element_type=jnp.float32)
            if i == depth - 1 and fc_bias:
                z = z + b_ref[...]
            if store_features and i < depth - 1:
                feat_refs[i][...] = z                        # lane-dense store
        out_ref[...] = z                                     # lane-dense store

        # ---- per-lane partial data term: sum over samples of (out - Y)^2 ----
        diff = z - y_ref[...]
        partial = jnp.sum(diff * diff, axis=0, keepdims=True) * inv_2n  # (1, cp)
        ploss_ref[...] = partial.reshape(1, 1, partial.shape[-1])

    return kernel


# --------------------------------------------------------------------------- #
# Wrapper                                                                     #
# --------------------------------------------------------------------------- #
def synthetic_forward(H, weights, bias, Y, *, weight_decay, feature_decay,
                      return_features=True, tm=None):
    """Pallas equivalent of SyntheticModel.forward.

    Returns (out, loss, features_list) like the torch module; features_list is
    already reversed: [z_{L-1}, ..., z_1, H].  With return_features=False the
    feature HBM writebacks are skipped and None is returned in their place.
    """
    H = jnp.asarray(H, jnp.float32)
    Y = jnp.asarray(Y, jnp.float32)
    weights = [jnp.asarray(w, jnp.float32) for w in weights]

    N, hidden = H.shape
    depth = len(weights)
    num_classes = weights[-1].shape[0]
    fc_bias = bias is not None

    # Lane-dense zero-padding (layout plumbing only; exact zeros everywhere).
    hp = _round_up(hidden, 128)
    cp = _round_up(num_classes, 128)
    Hp = _pad2(H, N, hp)
    Yp = _pad2(Y, N, cp)
    # Pad AND pre-transpose weights once to (in, out): MXU-native layout,
    # no per-grid-step XLU transpose inside the kernel.
    wps = []
    for i, w in enumerate(weights):
        out_p = hp if i < depth - 1 else cp
        wps.append(_pad2(w, out_p, hp).T)                    # (hp, out_p)
    bp = None
    if fc_bias:
        bp = _pad2(jnp.asarray(bias, jnp.float32).reshape(1, num_classes), 1, cp)

    # ---- tile selection (megacore-aware) + generation-aware VMEM policy -----
    cap = _vmem_cap_bytes()
    want_splits = _cores_per_chip()       # >= 2 grid steps on 2-TC parts
    if tm is None:
        tm = _pick_tm(N, want_splits)
        for t in [x for x in _divisor_tiles(N) if x <= tm]:
            tm = t                         # shrink the tile (real back-pressure)
            if _estimate_vmem_bytes(t, hp, cp, depth, fc_bias,
                                    return_features, 1) <= cap:
                break
    assert N % tm == 0, "sample count must be divisible by the tile size"
    grid = (N // tm,)

    kernel = _make_kernel(depth, fc_bias, return_features, 1.0 / (2.0 * N))

    def _run(single_buffer_weights):
        pm = ({"pipeline_mode": pl.Buffered(1)}
              if single_buffer_weights else {})

        in_specs = [pl.BlockSpec((tm, hp), lambda i: (i, 0))]
        inputs = [Hp]
        for w in wps:                      # resident weights (constant index)
            in_specs.append(pl.BlockSpec(w.shape, lambda i: (0, 0), **pm))
            inputs.append(w)
        if fc_bias:
            in_specs.append(pl.BlockSpec((1, cp), lambda i: (0, 0), **pm))
            inputs.append(bp)
        in_specs.append(pl.BlockSpec((tm, cp), lambda i: (i, 0)))
        inputs.append(Yp)

        out_shapes, out_specs = [], []
        if return_features:
            out_shapes += [jax.ShapeDtypeStruct((N, hp), jnp.float32)
                           for _ in range(depth - 1)]
            out_specs += [pl.BlockSpec((tm, hp), lambda i: (i, 0))
                          for _ in range(depth - 1)]
        out_shapes += [jax.ShapeDtypeStruct((N, cp), jnp.float32),
                       jax.ShapeDtypeStruct((grid[0], 1, cp), jnp.float32)]
        out_specs += [pl.BlockSpec((tm, cp), lambda i: (i, 0)),
                      pl.BlockSpec((1, 1, cp), lambda i: (i, 0, 0))]

        wbuf = 1 if single_buffer_weights else 2
        est = _estimate_vmem_bytes(tm, hp, cp, depth, fc_bias,
                                   return_features, wbuf)
        vmem_limit = int(min(cap, max(est, 32 * 1024 * 1024)))

        fn = pl.pallas_call(
            kernel,
            out_shape=tuple(out_shapes),
            grid_spec=pltpu.PrefetchScalarGridSpec(
                num_scalar_prefetch=0,
                grid=grid,
                in_specs=in_specs,
                out_specs=tuple(out_specs)),
            # No cross-step state: sample tiles are fully independent and can
            # shard across both TensorCores on 2-TC parts.
            compiler_params=pltpu.CompilerParams(
                dimension_semantics=("parallel",),
                vmem_limit_bytes=vmem_limit),
        )
        return fn(*inputs)

    try:
        results = _run(True)     # resident weights single-buffered
    except Exception:
        results = _run(False)    # fallback: default double buffering

    results = list(results)
    nf = depth - 1 if return_features else 0
    feats_p = results[:nf]
    out_p = results[nf]
    ploss = results[nf + 1]

    out = out_p[:, :num_classes]

    # Regularizers and the final loss reduction hoisted out of the kernel
    # (tiny f32 reductions; this is what keeps the grid axis "parallel").
    data_loss = jnp.sum(ploss)
    wd_loss = (weight_decay * 0.5) * sum(jnp.sum(w * w) for w in weights)
    fd_loss = (feature_decay * 0.5) * jnp.sum(H * H)
    loss = data_loss + wd_loss + fd_loss

    if not return_features:
        return out, loss, None

    feats = [f[:, :hidden] for f in feats_p]
    features_list = [H] + feats            # [H, z1, ..., z_{L-1}]
    features_list.reverse()                # matches torch: reversed
    return out, loss, features_list


# --------------------------------------------------------------------------- #
# Pure-JAX reference (validation only)                                        #
# --------------------------------------------------------------------------- #
def reference_forward(H, weights, bias, Y, *, weight_decay, feature_decay):
    N = H.shape[0]
    depth = len(weights)
    feats = [H]
    out = H @ weights[0].T
    if depth > 1:
        feats.append(out)
        for i in range(1, depth - 1):
            out = out @ weights[i].T
            feats.append(out)
        out = out @ weights[-1].T
        if bias is not None:
            out = out + bias
    else:
        if bias is not None:
            out = out + bias
    loss = jnp.sum((out - Y) ** 2) / (2.0 * N)
    loss = loss + weight_decay / 2.0 * sum(jnp.sum(w ** 2) for w in weights)
    loss = loss + feature_decay / 2.0 * jnp.sum(H ** 2)
    feats.reverse()
    return out, loss, feats


if __name__ == "__main__":
    # Small, self-consistent configuration.
    hidden = 32
    num_classes = 4
    depth_linear = 3
    fc_bias = True
    weight_decay = 5e-4
    feature_decay = 1e-4
    NUM_CLASS_SAMPLES = [32, 32, 32, 32]
    NUM_SAMPLES = sum(NUM_CLASS_SAMPLES)   # 128

    key = jax.random.PRNGKey(0)
    k_h, k_b, *k_ws = jax.random.split(key, 2 + depth_linear)

    # H ~ Normal(0, 0.1), same as torch.normal(0, 0.1, ...)
    H = 0.1 * jax.random.normal(k_h, (NUM_SAMPLES, hidden), jnp.float32)

    # Linear weights ~ Normal(0, 0.1); torch layout (out_features, in_features)
    weights = []
    for i in range(depth_linear):
        out_f = hidden if i < depth_linear - 1 else num_classes
        weights.append(
            0.1 * jax.random.normal(k_ws[i], (out_f, hidden), jnp.float32))

    # Last-layer bias (only if fc_bias)
    bias = None
    if fc_bias:
        bound = 1.0 / (hidden ** 0.5)
        bias = jax.random.uniform(k_b, (num_classes,), jnp.float32,
                                  -bound, bound)

    # Y: one-hot class targets (4 classes x 32 samples)
    labels = jnp.repeat(jnp.arange(num_classes),
                        NUM_CLASS_SAMPLES[0]).astype(jnp.int32)
    Y = jax.nn.one_hot(labels, num_classes, dtype=jnp.float32)

    out, loss, feats = synthetic_forward(
        H, weights, bias, Y,
        weight_decay=weight_decay, feature_decay=feature_decay)
    jax.block_until_ready((out, loss, feats))

    # Validate against the pure-JAX reference.
    ref_out, ref_loss, ref_feats = reference_forward(
        H, weights, bias, Y,
        weight_decay=weight_decay, feature_decay=feature_decay)
    assert out.shape == (NUM_SAMPLES, num_classes)
    assert jnp.allclose(out, ref_out, atol=1e-5, rtol=1e-5)
    assert jnp.allclose(loss, ref_loss, atol=1e-5, rtol=1e-5)
    assert len(feats) == len(ref_feats) == depth_linear
    for a, b in zip(feats, ref_feats):
        assert jnp.allclose(a, b, atol=1e-5, rtol=1e-5)

    # Lightweight path: skip feature writebacks (out + loss only).
    out2, loss2, feats2 = synthetic_forward(
        H, weights, bias, Y,
        weight_decay=weight_decay, feature_decay=feature_decay,
        return_features=False)
    jax.block_until_ready((out2, loss2))
    assert feats2 is None
    assert jnp.allclose(out2, ref_out, atol=1e-5, rtol=1e-5)
    assert jnp.allclose(loss2, ref_loss, atol=1e-5, rtol=1e-5)

    print("KERNEL_OK")
</pallas_src>

<mosaic_0001>
module attributes {stable_mosaic.version = 11 : i64} {
  func.func @kernel(%arg0: i32, %arg1: memref<128x128xf32, #tpu.memory_space<vmem>>, %arg2: memref<128x128xf32, #tpu.memory_space<vmem>>, %arg3: memref<128x128xf32, #tpu.memory_space<vmem>>, %arg4: memref<128x128xf32, #tpu.memory_space<vmem>>, %arg5: memref<1x128xf32, #tpu.memory_space<vmem>>, %arg6: memref<128x128xf32, #tpu.memory_space<vmem>>, %arg7: memref<128x128xf32, #tpu.memory_space<vmem>>, %arg8: memref<128x128xf32, #tpu.memory_space<vmem>>, %arg9: memref<128x128xf32, #tpu.memory_space<vmem>>, %arg10: memref<1x1x128xf32, #tpu.memory_space<vmem>>) attributes {dimension_semantics = [#tpu.dimension_semantics<parallel>], iteration_bounds = array<i64: 1>, scalar_prefetch = 0 : i64, scratch_operands = 0 : i64, tpu.core_type = #tpu.core_type<tc>, window_params = [{transform_indices = @transform_0, window_bounds = array<i64: 128, 128>}, {pipeline_mode = #tpu.pipeline_mode<synchronous>, transform_indices = @transform_1, window_bounds = array<i64: 128, 128>}, {pipeline_mode = #tpu.pipeline_mode<synchronous>, transform_indices = @transform_2, window_bounds = array<i64: 128, 128>}, {pipeline_mode = #tpu.pipeline_mode<synchronous>, transform_indices = @transform_3, window_bounds = array<i64: 128, 128>}, {pipeline_mode = #tpu.pipeline_mode<synchronous>, transform_indices = @transform_4, window_bounds = array<i64: 1, 128>}, {transform_indices = @transform_5, window_bounds = array<i64: 128, 128>}, {transform_indices = @transform_6, window_bounds = array<i64: 128, 128>}, {transform_indices = @transform_7, window_bounds = array<i64: 128, 128>}, {transform_indices = @transform_8, window_bounds = array<i64: 128, 128>}, {transform_indices = @transform_9, window_bounds = array<i64: 1, 1, 128>}]} {
    %c0 = arith.constant 0 : index
    %c0_0 = arith.constant 0 : index
    %0 = vector.load %arg1[%c0, %c0_0] : memref<128x128xf32, #tpu.memory_space<vmem>>, vector<128x128xf32>
    %c0_1 = arith.constant 0 : index
    %c0_2 = arith.constant 0 : index
    %1 = vector.load %arg2[%c0_1, %c0_2] : memref<128x128xf32, #tpu.memory_space<vmem>>, vector<128x128xf32>
    %cst = arith.constant dense<0.000000e+00> : vector<128x128xf32>
    %2 = tpu.matmul %0, %1, %cst {dimension_numbers = #tpu.dot_dimension_numbers<[1], [0], [0], [1], [0, 0, 1, 1], [], []>} : vector<128x128xf32>, vector<128x128xf32>, vector<128x128xf32> -> vector<128x128xf32>
    %c0_3 = arith.constant 0 : index
    %c0_4 = arith.constant 0 : index
    %3 = vector.load %arg7[%c0_3, %c0_4] : memref<128x128xf32, #tpu.memory_space<vmem>>, vector<128x128xf32>
    tpu.vector_store %arg7[%c0_3, %c0_4], %2 {strides = array<i32>} : memref<128x128xf32, #tpu.memory_space<vmem>>, vector<128x128xf32>,
    %c0_5 = arith.constant 0 : index
    %c0_6 = arith.constant 0 : index
    %4 = vector.load %arg3[%c0_5, %c0_6] : memref<128x128xf32, #tpu.memory_space<vmem>>, vector<128x128xf32>
    %cst_7 = arith.constant dense<0.000000e+00> : vector<128x128xf32>
    %5 = tpu.matmul %2, %4, %cst_7 {dimension_numbers = #tpu.dot_dimension_numbers<[1], [0], [0], [1], [0, 0, 1, 1], [], []>} : vector<128x128xf32>, vector<128x128xf32>, vector<128x128xf32> -> vector<128x128xf32>
    %c0_8 = arith.constant 0 : index
    %c0_9 = arith.constant 0 : index
    %6 = vector.load %arg8[%c0_8, %c0_9] : memref<128x128xf32, #tpu.memory_space<vmem>>, vector<128x128xf32>
    tpu.vector_store %arg8[%c0_8, %c0_9], %5 {strides = array<i32>} : memref<128x128xf32, #tpu.memory_space<vmem>>, vector<128x128xf32>,
    %c0_10 = arith.constant 0 : index
    %c0_11 = arith.constant 0 : index
    %7 = vector.load %arg4[%c0_10, %c0_11] : memref<128x128xf32, #tpu.memory_space<vmem>>, vector<128x128xf32>
    %cst_12 = arith.constant dense<0.000000e+00> : vector<128x128xf32>
    %8 = tpu.matmul %5, %7, %cst_12 {dimension_numbers = #tpu.dot_dimension_numbers<[1], [0], [0], [1], [0, 0, 1, 1], [], []>} : vector<128x128xf32>, vector<128x128xf32>, vector<128x128xf32> -> vector<128x128xf32>
    %c0_13 = arith.constant 0 : index
    %c0_14 = arith.constant 0 : index
    %9 = vector.load %arg5[%c0_13, %c0_14] : memref<1x128xf32, #tpu.memory_space<vmem>>, vector<1x128xf32>
    %10 = vector.broadcast %9 : vector<1x128xf32> to vector<128x128xf32>
    %11 = arith.addf %8, %10 : vector<128x128xf32>
    %c0_15 = arith.constant 0 : index
    %c0_16 = arith.constant 0 : index
    %12 = vector.load %arg9[%c0_15, %c0_16] : memref<128x128xf32, #tpu.memory_space<vmem>>, vector<128x128xf32>
    tpu.vector_store %arg9[%c0_15, %c0_16], %11 {strides = array<i32>} : memref<128x128xf32, #tpu.memory_space<vmem>>, vector<128x128xf32>,
    %c0_17 = arith.constant 0 : index
    %c0_18 = arith.constant 0 : index
    %13 = vector.load %arg6[%c0_17, %c0_18] : memref<128x128xf32, #tpu.memory_space<vmem>>, vector<128x128xf32>
    %14 = arith.subf %11, %13 : vector<128x128xf32>
    %15 = arith.mulf %14, %14 : vector<128x128xf32>
    %cst_19 = arith.constant dense<0.000000e+00> : vector<128xf32>
    %16 = vector.multi_reduction <add>, %15, %cst_19 [0] : vector<128x128xf32> to vector<128xf32>
    %17 = vector.shape_cast %16 : vector<128xf32> to vector<1x128xf32>
    %cst_20 = arith.constant 3.906250e-03 : f32
    %18 = vector.broadcast %cst_20 : f32 to vector<1x128xf32>
    %19 = arith.mulf %17, %18 : vector<1x128xf32>
    %20 = vector.shape_cast %19 : vector<1x128xf32> to vector<1x1x128xf32>
    %c0_21 = arith.constant 0 : index
    %c0_22 = arith.constant 0 : index
    %c0_23 = arith.constant 0 : index
    %21 = vector.load %arg10[%c0_21, %c0_22, %c0_23] : memref<1x1x128xf32, #tpu.memory_space<vmem>>, vector<1x1x128xf32>
    tpu.vector_store %arg10[%c0_21, %c0_22, %c0_23], %20 {strides = array<i32>} : memref<1x1x128xf32, #tpu.memory_space<vmem>>, vector<1x1x128xf32>,
    return
  }
  func.func @transform_0(%arg0: i32) -> (i32, i32) {
    %c0_i32 = arith.constant 0 : i32
    %c0_i32_0 = arith.constant 0 : i32
    return %arg0, %c0_i32 : i32, i32
  }
  func.func @transform_1(%arg0: i32) -> (i32, i32) {
    %c0_i32 = arith.constant 0 : i32
    %c0_i32_0 = arith.constant 0 : i32
    %c0_i32_1 = arith.constant 0 : i32
    return %c0_i32, %c0_i32_0 : i32, i32
  }
  func.func @transform_2(%arg0: i32) -> (i32, i32) {
    %c0_i32 = arith.constant 0 : i32
    %c0_i32_0 = arith.constant 0 : i32
    %c0_i32_1 = arith.constant 0 : i32
    return %c0_i32, %c0_i32_0 : i32, i32
  }
  func.func @transform_3(%arg0: i32) -> (i32, i32) {
    %c0_i32 = arith.constant 0 : i32
    %c0_i32_0 = arith.constant 0 : i32
    %c0_i32_1 = arith.constant 0 : i32
    return %c0_i32, %c0_i32_0 : i32, i32
  }
  func.func @transform_4(%arg0: i32) -> (i32, i32) {
    %c0_i32 = arith.constant 0 : i32
    %c0_i32_0 = arith.constant 0 : i32
    %c0_i32_1 = arith.constant 0 : i32
    return %c0_i32, %c0_i32_0 : i32, i32
  }
  func.func @transform_5(%arg0: i32) -> (i32, i32) {
    %c0_i32 = arith.constant 0 : i32
    %c0_i32_0 = arith.constant 0 : i32
    return %arg0, %c0_i32 : i32, i32
  }
  func.func @transform_6(%arg0: i32) -> (i32, i32) {
    %c0_i32 = arith.constant 0 : i32
    %c0_i32_0 = arith.constant 0 : i32
    return %arg0, %c0_i32 : i32, i32
  }
  func.func @transform_7(%arg0: i32) -> (i32, i32) {
    %c0_i32 = arith.constant 0 : i32
    %c0_i32_0 = arith.constant 0 : i32
    return %arg0, %c0_i32 : i32, i32
  }
  func.func @transform_8(%arg0: i32) -> (i32, i32) {
    %c0_i32 = arith.constant 0 : i32
    %c0_i32_0 = arith.constant 0 : i32
    return %arg0, %c0_i32 : i32, i32
  }
  func.func @transform_9(%arg0: i32) -> (i32, i32, i32) {
    %c0_i32 = arith.constant 0 : i32
    %c0_i32_0 = arith.constant 0 : i32
    %c0_i32_1 = arith.constant 0 : i32
    return %arg0, %c0_i32, %c0_i32_0 : i32, i32, i32
  }
}

module attributes {stable_mosaic.version = 11 : i64} {
  func.func @kernel(%arg0: i32, %arg1: memref<128x128xf32, #tpu.memory_space<vmem>>, %arg2: memref<128x128xf32, #tpu.memory_space<vmem>>, %arg3: memref<128x128xf32, #tpu.memory_space<vmem>>, %arg4: memref<128x128xf32, #tpu.memory_space<vmem>>, %arg5: memref<1x128xf32, #tpu.memory_space<vmem>>, %arg6: memref<128x128xf32, #tpu.memory_space<vmem>>, %arg7: memref<128x128xf32, #tpu.memory_space<vmem>>, %arg8: memref<128x128xf32, #tpu.memory_space<vmem>>, %arg9: memref<128x128xf32, #tpu.memory_space<vmem>>, %arg10: memref<1x1x128xf32, #tpu.memory_space<vmem>>) attributes {dimension_semantics = [#tpu.dimension_semantics<parallel>], iteration_bounds = array<i64: 1>, scalar_prefetch = 0 : i64, scratch_operands = 0 : i64, tpu.core_type = #tpu.core_type<tc>, window_params = [{transform_indices = @transform_0, window_bounds = array<i64: 128, 128>}, {pipeline_mode = #tpu.pipeline_mode<synchronous>, transform_indices = @transform_1, window_bounds = array<i64: 128, 128>}, {pipeline_mode = #tpu.pipeline_mode<synchronous>, transform_indices = @transform_2, window_bounds = array<i64: 128, 128>}, {pipeline_mode = #tpu.pipeline_mode<synchronous>, transform_indices = @transform_3, window_bounds = array<i64: 128, 128>}, {pipeline_mode = #tpu.pipeline_mode<synchronous>, transform_indices = @transform_4, window_bounds = array<i64: 1, 128>}, {transform_indices = @transform_5, window_bounds = array<i64: 128, 128>}, {transform_indices = @transform_6, window_bounds = array<i64: 128, 128>}, {transform_indices = @transform_7, window_bounds = array<i64: 128, 128>}, {transform_indices = @transform_8, window_bounds = array<i64: 128, 128>}, {transform_indices = @transform_9, window_bounds = array<i64: 1, 1, 128>}]} {
    %c0 = arith.constant 0 : index
    %c0_0 = arith.constant 0 : index
    %0 = vector.load %arg1[%c0, %c0_0] : memref<128x128xf32, #tpu.memory_space<vmem>>, vector<128x128xf32>
    %c0_1 = arith.constant 0 : index
    %c0_2 = arith.constant 0 : index
    %1 = vector.load %arg2[%c0_1, %c0_2] : memref<128x128xf32, #tpu.memory_space<vmem>>, vector<128x128xf32>
    %cst = arith.constant dense<0.000000e+00> : vector<128x128xf32>
    %2 = tpu.matmul %0, %1, %cst {dimension_numbers = #tpu.dot_dimension_numbers<[1], [0], [0], [1], [0, 0, 1, 1], [], []>} : vector<128x128xf32>, vector<128x128xf32>, vector<128x128xf32> -> vector<128x128xf32>
    %c0_3 = arith.constant 0 : index
    %c0_4 = arith.constant 0 : index
    %3 = vector.load %arg7[%c0_3, %c0_4] : memref<128x128xf32, #tpu.memory_space<vmem>>, vector<128x128xf32>
    tpu.vector_store %arg7[%c0_3, %c0_4], %2 {strides = array<i32>} : memref<128x128xf32, #tpu.memory_space<vmem>>, vector<128x128xf32>,
    %c0_5 = arith.constant 0 : index
    %c0_6 = arith.constant 0 : index
    %4 = vector.load %arg3[%c0_5, %c0_6] : memref<128x128xf32, #tpu.memory_space<vmem>>, vector<128x128xf32>
    %cst_7 = arith.constant dense<0.000000e+00> : vector<128x128xf32>
    %5 = tpu.matmul %2, %4, %cst_7 {dimension_numbers = #tpu.dot_dimension_numbers<[1], [0], [0], [1], [0, 0, 1, 1], [], []>} : vector<128x128xf32>, vector<128x128xf32>, vector<128x128xf32> -> vector<128x128xf32>
    %c0_8 = arith.constant 0 : index
    %c0_9 = arith.constant 0 : index
    %6 = vector.load %arg8[%c0_8, %c0_9] : memref<128x128xf32, #tpu.memory_space<vmem>>, vector<128x128xf32>
    tpu.vector_store %arg8[%c0_8, %c0_9], %5 {strides = array<i32>} : memref<128x128xf32, #tpu.memory_space<vmem>>, vector<128x128xf32>,
    %c0_10 = arith.constant 0 : index
    %c0_11 = arith.constant 0 : index
    %7 = vector.load %arg4[%c0_10, %c0_11] : memref<128x128xf32, #tpu.memory_space<vmem>>, vector<128x128xf32>
    %cst_12 = arith.constant dense<0.000000e+00> : vector<128x128xf32>
    %8 = tpu.matmul %5, %7, %cst_12 {dimension_numbers = #tpu.dot_dimension_numbers<[1], [0], [0], [1], [0, 0, 1, 1], [], []>} : vector<128x128xf32>, vector<128x128xf32>, vector<128x128xf32> -> vector<128x128xf32>
    %c0_13 = arith.constant 0 : index
    %c0_14 = arith.constant 0 : index
    %9 = vector.load %arg5[%c0_13, %c0_14] : memref<1x128xf32, #tpu.memory_space<vmem>>, vector<1x128xf32>
    %10 = vector.broadcast %9 : vector<1x128xf32> to vector<128x128xf32>
    %11 = arith.addf %8, %10 : vector<128x128xf32>
    %c0_15 = arith.constant 0 : index
    %c0_16 = arith.constant 0 : index
    %12 = vector.load %arg9[%c0_15, %c0_16] : memref<128x128xf32, #tpu.memory_space<vmem>>, vector<128x128xf32>
    tpu.vector_store %arg9[%c0_15, %c0_16], %11 {strides = array<i32>} : memref<128x128xf32, #tpu.memory_space<vmem>>, vector<128x128xf32>,
    %c0_17 = arith.constant 0 : index
    %c0_18 = arith.constant 0 : index
    %13 = vector.load %arg6[%c0_17, %c0_18] : memref<128x128xf32, #tpu.memory_space<vmem>>, vector<128x128xf32>
    %14 = arith.subf %11, %13 : vector<128x128xf32>
    %15 = arith.mulf %14, %14 : vector<128x128xf32>
    %cst_19 = arith.constant dense<0.000000e+00> : vector<128xf32>
    %16 = vector.multi_reduction <add>, %15, %cst_19 [0] : vector<128x128xf32> to vector<128xf32>
    %17 = vector.shape_cast %16 : vector<128xf32> to vector<1x128xf32>
    %cst_20 = arith.constant 3.906250e-03 : f32
    %18 = vector.broadcast %cst_20 : f32 to vector<1x128xf32>
    %19 = arith.mulf %17, %18 : vector<1x128xf32>
    %20 = vector.shape_cast %19 : vector<1x128xf32> to vector<1x1x128xf32>
    %c0_21 = arith.constant 0 : index
    %c0_22 = arith.constant 0 : index
    %c0_23 = arith.constant 0 : index
    %21 = vector.load %arg10[%c0_21, %c0_22, %c0_23] : memref<1x1x128xf32, #tpu.memory_space<vmem>>, vector<1x1x128xf32>
    tpu.vector_store %arg10[%c0_21, %c0_22, %c0_23], %20 {strides = array<i32>} : memref<1x1x128xf32, #tpu.memory_space<vmem>>, vector<1x1x128xf32>,
    return
  }
  func.func @transform_0(%arg0: i32) -> (i32, i32) {
    %c0_i32 = arith.constant 0 : i32
    %c0_i32_0 = arith.constant 0 : i32
    return %arg0, %c0_i32 : i32, i32
  }
  func.func @transform_1(%arg0: i32) -> (i32, i32) {
    %c0_i32 = arith.constant 0 : i32
    %c0_i32_0 = arith.constant 0 : i32
    %c0_i32_1 = arith.constant 0 : i32
    return %c0_i32, %c0_i32_0 : i32, i32
  }
  func.func @transform_2(%arg0: i32) -> (i32, i32) {
    %c0_i32 = arith.constant 0 : i32
    %c0_i32_0 = arith.constant 0 : i32
    %c0_i32_1 = arith.constant 0 : i32
    return %c0_i32, %c0_i32_0 : i32, i32
  }
  func.func @transform_3(%arg0: i32) -> (i32, i32) {
    %c0_i32 = arith.constant 0 : i32
    %c0_i32_0 = arith.constant 0 : i32
    %c0_i32_1 = arith.constant 0 : i32
    return %c0_i32, %c0_i32_0 : i32, i32
  }
  func.func @transform_4(%arg0: i32) -> (i32, i32) {
    %c0_i32 = arith.constant 0 : i32
    %c0_i32_0 = arith.constant 0 : i32
    %c0_i32_1 = arith.constant 0 : i32
    return %c0_i32, %c0_i32_0 : i32, i32
  }
  func.func @transform_5(%arg0: i32) -> (i32, i32) {
    %c0_i32 = arith.constant 0 : i32
    %c0_i32_0 = arith.constant 0 : i32
    return %arg0, %c0_i32 : i32, i32
  }
  func.func @transform_6(%arg0: i32) -> (i32, i32) {
    %c0_i32 = arith.constant 0 : i32
    %c0_i32_0 = arith.constant 0 : i32
    return %arg0, %c0_i32 : i32, i32
  }
  func.func @transform_7(%arg0: i32) -> (i32, i32) {
    %c0_i32 = arith.constant 0 : i32
    %c0_i32_0 = arith.constant 0 : i32
    return %arg0, %c0_i32 : i32, i32
  }
  func.func @transform_8(%arg0: i32) -> (i32, i32) {
    %c0_i32 = arith.constant 0 : i32
    %c0_i32_0 = arith.constant 0 : i32
    return %arg0, %c0_i32 : i32, i32
  }
  func.func @transform_9(%arg0: i32) -> (i32, i32, i32) {
    %c0_i32 = arith.constant 0 : i32
    %c0_i32_0 = arith.constant 0 : i32
    %c0_i32_1 = arith.constant 0 : i32
    return %arg0, %c0_i32, %c0_i32_0 : i32, i32, i32
  }
}

</mosaic_0001>

<bundles_post_ra>
// kernel: tpu_custom_call.1
= control target key start
LH: loop header
LB: loop body
LE: loop exit
PB: predicated region body
PF: predicated region fallthrough
CT: control target
= control target key end

     0   :  { %15 = vsyncpa [#allocation3], 0  ;;  %s1480_s0 = inlined_call_operand.hbm [shape: f32[128,128], index: 0, kind: input, shape index: {}]   ;;  %s1481_s1 = inlined_call_operand.hbm [shape: f32[128,128], index: 1, kind: input, shape index: {}]   ;;  %s1482_s2 = inlined_call_operand.hbm [shape: f32[128,128], index: 2, kind: input, shape index: {}]   ;;  %s1483_s3 = inlined_call_operand.hbm [shape: f32[128,128], index: 3, kind: input, shape index: {}]   ;;  %s1484_s4 = inlined_call_operand.vmem [shape: f32[1,128], index: 4, kind: input, shape index: {}]   ;;  %s1485_s5 = inlined_call_operand.hbm [shape: f32[128,128], index: 5, kind: input, shape index: {}]   ;;  %s1486_s6 = inlined_call_operand.hbm [shape: f32[128,128], index: 6, kind: output, shape index: {0}]   ;;  %s1487_s7 = inlined_call_operand.hbm [shape: f32[128,128], index: 7, kind: output, shape index: {1}]   ;;  %s1488_s8 = inlined_call_operand.hbm [shape: f32[128,128], index: 8, kind: output, shape index: {2}]   ;;  %s1489_s9 = inlined_call_operand.hbm [shape: f32[1,1,128], index: 9, kind: output, shape index: {3}]  }
   0x1   :  { %16 = vsyncpa [#allocation6], 0 }
   0x2   :  { %17 = vsyncpa [#allocation9], 0 }
   0x3   :  { %18 = vsyncpa [#allocation4], 0 }
   0x4   :  { %19 = vsyncpa [#allocation13], 0 }
   0x5   :  { %20 = vsyncpa [#allocation16], 0  ;;  %s1287_s30 = smov [#allocation5]   ;;  %s1288_s11 = smov [#allocation8]  }
   0x6   :  { %s38_s10 = sshll.u32 %s1287_s30, 4  ;;  %s62_s12 = sshll.u32 %s1288_s11, 4  ;;  %s39_s10 = int_to_ptr.vmem [resolvable:$true] %s38_s10  ;;  %s63_s12 = int_to_ptr.vmem [resolvable:$true] %s62_s12 }
   0x7   :  { %s1103_s13 = scalar_lea.vmem %s39_s10, 2048  ;;  %p1108_p1 = scmp.lt.s32.totalorder %s39_s10, %s39_s10 }
   0x8   :  { %p1104_p0 = scmp.ne.s32.totalorder %s39_s10, %s1103_s13  ;;  %p1109_p2 = scmp.lt.s32.totalorder %s1103_s13, %s1103_s13 }
   0xa   :  { %p1110_p3 = por %p1109_p2, %p1108_p1 }
   0xc   :  { %p1111_p4 = pnand %p1110_p3, %p1104_p0 }
   0xe   :  { %1114 = shalt.err (!%p1111_p4)
}
   0xf   :  { %s1289_s14 = smov 128   ;;  %s1290_s15 = smov 8  }
  0x10   :  { %44 = dma.hbm_to_vmem [thread:$0]  %s1481_s1, 2048, %s39_s10, [#allocation6], %s1289_s14, %s1289_s14, %s1290_s15  }
  0x11   :  { %s1123_s18 = scalar_lea.vmem %s63_s12, 2048  ;;  %p1128_p6 = scmp.lt.s32.totalorder %s63_s12, %s63_s12 }
  0x12   :  { %p1124_p5 = scmp.ne.s32.totalorder %s63_s12, %s1123_s18  ;;  %p1129_p7 = scmp.lt.s32.totalorder %s1123_s18, %s1123_s18 }
  0x14   :  { %p1130_p8 = por %p1129_p7, %p1128_p6 }
  0x16   :  { %p1131_p9 = pnand %p1130_p8, %p1124_p5 }
  0x18   :  { %1134 = shalt.err (!%p1131_p9)
}
  0x19   :  { %68 = dma.hbm_to_vmem [thread:$0]  %s1483_s3, 2048, %s63_s12, [#allocation9], %s1289_s14, %s1289_s14, %s1290_s15  }
  0x1a   :  { %s1291_s21 = smov [#allocation2]   ;;  %s1292_s23 = smov [#allocation7]  }
  0x1b   :  { %s26_s22 = sshll.u32 %s1291_s21, 4  ;;  %s50_s24 = sshll.u32 %s1292_s23, 4  ;;  %s27_s22 = int_to_ptr.vmem [resolvable:$true] %s26_s22  ;;  %s51_s24 = int_to_ptr.vmem [resolvable:$true] %s50_s24 }
  0x1c   :  { %s1143_s1 = scalar_lea.vmem %s27_s22, 2048  ;;  %p1148_p11 = scmp.lt.s32.totalorder %s27_s22, %s27_s22 }
  0x1d   :  { %p1144_p10 = scmp.ne.s32.totalorder %s27_s22, %s1143_s1  ;;  %p1149_p12 = scmp.lt.s32.totalorder %s1143_s1, %s1143_s1 }
  0x1f   :  { %p1150_p13 = por %p1149_p12, %p1148_p11 }
  0x21   :  { %p1151_p0 = pnand %p1150_p13, %p1144_p10 }
  0x23   :  { %1154 = shalt.err (!%p1151_p0)
}
  0x24   :  { %32 = dma.hbm_to_vmem [thread:$0]  %s1480_s0, 2048, %s27_s22, [#allocation3], %s1289_s14, %s1289_s14, %s1290_s15  }
  0x25   :  { %s1163_s3 = scalar_lea.vmem %s51_s24, 2048  ;;  %p1168_p2 = scmp.lt.s32.totalorder %s51_s24, %s51_s24 }
  0x26   :  { %p1164_p1 = scmp.ne.s32.totalorder %s51_s24, %s1163_s3  ;;  %p1169_p3 = scmp.lt.s32.totalorder %s1163_s3, %s1163_s3 }
  0x28   :  { %p1170_p4 = por %p1169_p3, %p1168_p2 }
  0x2a   :  { %p1171_p5 = pnand %p1170_p4, %p1164_p1 }
  0x2c   :  { %1174 = shalt.err (!%p1171_p5)
}
  0x2d   :  { %56 = dma.hbm_to_vmem [thread:$0]  %s1482_s2, 2048, %s51_s24, [#allocation6], %s1289_s14, %s1289_s14, %s1290_s15  }
  0x2e   :  { %s1293_s29 = smov [#allocation10]  }
  0x2f   :  { %s76_s30 = sshll.u32 %s1293_s29, 4  ;;  %s77_s30 = int_to_ptr.vmem [resolvable:$true] %s76_s30 }
  0x30   :  { %s1183_s10 = scalar_lea.vmem %s77_s30, 2048  ;;  %p1188_p7 = scmp.lt.s32.totalorder %s77_s30, %s77_s30 }
  0x31   :  { %p1184_p6 = scmp.ne.s32.totalorder %s77_s30, %s1183_s10  ;;  %p1189_p8 = scmp.lt.s32.totalorder %s1183_s10, %s1183_s10 }
  0x33   :  { %p1190_p9 = por %p1189_p8, %p1188_p7 }
  0x35   :  { %p1191_p10 = pnand %p1190_p9, %p1184_p6 }
  0x37   :  { %1194 = shalt.err (!%p1191_p10)
}
  0x38   :  { %82 = dma.hbm_to_vmem [thread:$0]  %s1485_s5, 2048, %s77_s30, [#allocation9], %s1289_s14, %s1289_s14, %s1290_s15  }
  0x39   :  { %1275 = dma.done.wait [#allocation3], 2048  }
  0x3a   :  { %1276 = vsyncadd [#allocation3], 4294965248 }
  0x3b   :  { %1277 = dma.done.wait [#allocation6], 4096  }
  0x3c   :  { %1278 = vsyncadd [#allocation6], 4294963200 }
  0x3d   :  { %1279 = dma.done.wait [#allocation9], 4096  }
  0x3e   :  { %1280 = vsyncadd [#allocation9], 4294963200  ;;  %v129_v0 = vld [vmem:[#allocation5 + $0x78] sm:$0xff]  ;;  %v128_v1 = vld [vmem:[#allocation5 + $0x70] sm:$0xff]  ;;  %s1294_s2 = smov [#allocation12]   ;;  %s1295_s12 = smov [#allocation11]  }
  0x3f   :  { %884 = vmatprep.subr.mxu0 %v129_v0  ;;  %v127_v2 = vld [vmem:[#allocation5 + $0x68] sm:$0xff]  ;;  %v126_v3 = vld [vmem:[#allocation5 + $0x60] sm:$0xff]  ;;  %v125_v5 = vld [vmem:[#allocation5 + $0x58] sm:$0xff]  ;;  %s740_s5 = sshll.u32 %s1294_s2, 4  ;;  %s728_s13 = sshll.u32 %s1295_s12, 4  ;;  %s741_s5 = int_to_ptr.vmem [resolvable:$true] %s740_s5  ;;  %s729_s13 = int_to_ptr.vmem [resolvable:$true] %s728_s13 }
  0x40   :  { %885 = vmatpush3.msra.mxu0 %v129_v0  ;;  %v98_v4 = vld [vmem:[#allocation2] sm:$0xff]  ;;  %v124_v6 = vld [vmem:[#allocation5 + $0x50] sm:$0xff]  ;;  %v123_v7 = vld [vmem:[#allocation5 + $0x48] sm:$0xff]  ;;  %s1195_s16 = scalar_lea.vmem %s741_s5, 2048  ;;  %p1200_p12 = scmp.lt.s32.totalorder %s741_s5, %s741_s5 }
  0x41   :  { %886 = vmatprep.subr.mxu0 %v128_v1  ;;  %916 = vmatprep.mubr.f32.mxu0 %v98_v4  ;;  %v306_v8 = vld [vmem:[#allocation7 + $0x78] sm:$0xff]  ;;  %v305_v9 = vld [vmem:[#allocation7 + $0x70] sm:$0xff]  ;;  %v122_v10 = vld [vmem:[#allocation5 + $0x40] sm:$0xff]  ;;  %p1196_p11 = scmp.ne.s32.totalorder %s741_s5, %s1195_s16  ;;  %p1201_p13 = scmp.lt.s32.totalorder %s1195_s16, %s1195_s16 }
  0x42   :  { %887 = vmatpush3.msra.mxu0 %v128_v1  ;;  %940 = vmatprep.subr.mxu1 %v306_v8  ;;  %v304_v11 = vld [vmem:[#allocation7 + $0x68] sm:$0xff]  ;;  %v121_v12 = vld [vmem:[#allocation5 + $0x38] sm:$0xff]  ;;  %v303_v13 = vld [vmem:[#allocation7 + $0x60] sm:$0xff] }
  0x43   :  { %888 = vmatprep.subr.mxu0 %v127_v2  ;;  %941 = vmatpush3.msra.mxu1 %v306_v8  ;;  %v120_v14 = vld [vmem:[#allocation5 + $0x30] sm:$0xff]  ;;  %v302_v15 = vld [vmem:[#allocation7 + $0x58] sm:$0xff]  ;;  %v119_v16 = vld [vmem:[#allocation5 + $0x28] sm:$0xff]  ;;  %p1202_p0 = por %p1201_p13, %p1200_p12 }
  0x44   :  { %889 = vmatpush3.msra.mxu0 %v127_v2  ;;  %942 = vmatprep.subr.mxu1 %v305_v9  ;;  %v301_v17 = vld [vmem:[#allocation7 + $0x50] sm:$0xff]  ;;  %v118_v18 = vld [vmem:[#allocation5 + $0x20] sm:$0xff]  ;;  %v300_v19 = vld [vmem:[#allocation7 + $0x48] sm:$0xff] }
  0x45   :  { %890 = vmatprep.subr.mxu0 %v126_v3  ;;  %943 = vmatpush3.msra.mxu1 %v305_v9  ;;  %v117_v20 = vld [vmem:[#allocation5 + $0x18] sm:$0xff]  ;;  %v299_v21 = vld [vmem:[#allocation7 + $0x40] sm:$0xff]  ;;  %v116_v22 = vld [vmem:[#allocation5 + $0x10] sm:$0xff]  ;;  %p1203_p1 = pnand %p1202_p0, %p1196_p11 }
  0x46   :  { %891 = vmatpush3.msra.mxu0 %v126_v3  ;;  %944 = vmatprep.subr.mxu1 %v304_v11  ;;  %v298_v23 = vld [vmem:[#allocation7 + $0x38] sm:$0xff]  ;;  %v115_v24 = vld [vmem:[#allocation5 + $0x8] sm:$0xff]  ;;  %v297_v25 = vld [vmem:[#allocation7 + $0x30] sm:$0xff] }
  0x47   :  { %892 = vmatprep.subr.mxu0 %v125_v5  ;;  %945 = vmatpush3.msra.mxu1 %v304_v11  ;;  %v114_v26 = vld [vmem:[#allocation5] sm:$0xff]  ;;  %v296_v27 = vld [vmem:[#allocation7 + $0x28] sm:$0xff]  ;;  %v100_v30 = vld [vmem:[#allocation2 + $0x10] sm:$0xff] }
  0x48   :  { %893 = vmatpush3.msra.mxu0 %v125_v5  ;;  %946 = vmatprep.subr.mxu1 %v303_v13  ;;  %v99_v28 = vld [vmem:[#allocation2 + $0x8] sm:$0xff]  ;;  %v295_v29 = vld [vmem:[#allocation7 + $0x20] sm:$0xff]  ;;  %v294_v31 = vld [vmem:[#allocation7 + $0x18] sm:$0xff] }
  0x49   :  { %894 = vmatprep.subr.mxu0 %v124_v6  ;;  %947 = vmatpush3.msra.mxu1 %v303_v13  ;;  %v101_v32 = vld [vmem:[#allocation2 + $0x18] sm:$0xff]  ;;  %v293_v33 = vld [vmem:[#allocation7 + $0x10] sm:$0xff]  ;;  %v102_v34 = vld [vmem:[#allocation2 + $0x20] sm:$0xff] }
  0x4a   :  { %895 = vmatpush3.msra.mxu0 %v124_v6  ;;  %948 = vmatprep.subr.mxu1 %v302_v15  ;;  %v103_v35 = vld [vmem:[#allocation2 + $0x28] sm:$0xff]  ;;  %v104_v36 = vld [vmem:[#allocation2 + $0x30] sm:$0xff]  ;;  %v105_v37 = vld [vmem:[#allocation2 + $0x38] sm:$0xff] }
  0x4b   :  { %896 = vmatprep.subr.mxu0 %v123_v7  ;;  %949 = vmatpush3.msra.mxu1 %v302_v15  ;;  %v106_v38 = vld [vmem:[#allocation2 + $0x40] sm:$0xff]  ;;  %v107_v39 = vld [vmem:[#allocation2 + $0x48] sm:$0xff]  ;;  %v108_v40 = vld [vmem:[#allocation2 + $0x50] sm:$0xff] }
  0x4c   :  { %897 = vmatpush3.msra.mxu0 %v123_v7  ;;  %950 = vmatprep.subr.mxu1 %v301_v17  ;;  %v109_v41 = vld [vmem:[#allocation2 + $0x58] sm:$0xff]  ;;  %v110_v42 = vld [vmem:[#allocation2 + $0x60] sm:$0xff]  ;;  %v111_v43 = vld [vmem:[#allocation2 + $0x68] sm:$0xff] }
  0x4d   :  { %898 = vmatprep.subr.mxu0 %v122_v10  ;;  %951 = vmatpush3.msra.mxu1 %v301_v17  ;;  %v112_v44 = vld [vmem:[#allocation2 + $0x70] sm:$0xff]  ;;  %v113_v45 = vld [vmem:[#allocation2 + $0x78] sm:$0xff]  ;;  %v292_v46 = vld [vmem:[#allocation7 + $0x8] sm:$0xff] }
  0x4e   :  { %899 = vmatpush3.msra.mxu0 %v122_v10  ;;  %952 = vmatprep.subr.mxu1 %v300_v19  ;;  %v291_v47 = vld [vmem:[#allocation7] sm:$0xff]  ;;  %v483_v48 = vld [vmem:[#allocation8 + $0x78] sm:$0xff]  ;;  %v482_v49 = vld [vmem:[#allocation8 + $0x70] sm:$0xff] }
  0x4f   :  { %900 = vmatprep.subr.mxu0 %v121_v12  ;;  %953 = vmatpush3.msra.mxu1 %v300_v19  ;;  %v481_v50 = vld [vmem:[#allocation8 + $0x68] sm:$0xff]  ;;  %v480_v51 = vld [vmem:[#allocation8 + $0x60] sm:$0xff]  ;;  %v479_v52 = vld [vmem:[#allocation8 + $0x58] sm:$0xff] }
  0x50   :  { %901 = vmatpush3.msra.mxu0 %v121_v12  ;;  %954 = vmatprep.subr.mxu1 %v299_v21  ;;  %v1378_v53 = vld [vmem:[#allocation8 + $0x50] sm:$0xff]  ;;  %v1380_v54 = vld [vmem:[#allocation8 + $0x48] sm:$0xff]  ;;  %v1384_v55 = vld [vmem:[#allocation8 + $0x40] sm:$0xff] }
  0x51   :  { %902 = vmatprep.subr.mxu0 %v120_v14  ;;  %955 = vmatpush3.msra.mxu1 %v299_v21  ;;  %v1388_v56 = vld [vmem:[#allocation8 + $0x38] sm:$0xff]  ;;  %v1392_v57 = vld [vmem:[#allocation8 + $0x30] sm:$0xff]  ;;  %v1396_v58 = vld [vmem:[#allocation8 + $0x28] sm:$0xff] }
  0x52   :  { %903 = vmatpush3.msra.mxu0 %v120_v14  ;;  %956 = vmatprep.subr.mxu1 %v298_v23  ;;  %v1400_v59 = vld [vmem:[#allocation8 + $0x20] sm:$0xff]  ;;  %v1404_v60 = vld [vmem:[#allocation8 + $0x18] sm:$0xff]  ;;  %v1408_v61 = vld [vmem:[#allocation8 + $0x10] sm:$0xff] }
  0x53   :  { %904 = vmatprep.subr.mxu0 %v119_v16  ;;  %957 = vmatpush3.msra.mxu1 %v298_v23  ;;  %v1412_v62 = vld [vmem:[#allocation8 + $0x8] sm:$0xff]  ;;  %v468_v15 = vld [vmem:[#allocation8] sm:$0xff] }
  0x54   :  { %905 = vmatpush3.msra.mxu0 %v119_v16  ;;  %958 = vmatprep.subr.mxu1 %v297_v25 }
  0x55   :  { %906 = vmatprep.subr.mxu0 %v118_v18  ;;  %959 = vmatpush3.msra.mxu1 %v297_v25 }
  0x56   :  { %907 = vmatpush3.msra.mxu0 %v118_v18  ;;  %960 = vmatprep.subr.mxu1 %v296_v27 }
  0x57   :  { %908 = vmatprep.subr.mxu0 %v117_v20  ;;  %961 = vmatpush3.msra.mxu1 %v296_v27 }
  0x58   :  { %909 = vmatpush3.msra.mxu0 %v117_v20  ;;  %962 = vmatprep.subr.mxu1 %v295_v29 }
  0x59   :  { %910 = vmatprep.subr.mxu0 %v116_v22  ;;  %963 = vmatpush3.msra.mxu1 %v295_v29 }
  0x5a   :  { %911 = vmatpush3.msra.mxu0 %v116_v22  ;;  %964 = vmatprep.subr.mxu1 %v294_v31 }
  0x5b   :  { %912 = vmatprep.subr.mxu0 %v115_v24  ;;  %965 = vmatpush3.msra.mxu1 %v294_v31 }
  0x5c   :  { %913 = vmatpush3.msra.mxu0 %v115_v24  ;;  %966 = vmatprep.subr.mxu1 %v293_v33 }
  0x5d   :  { %914 = vmatprep.subr.mxu0 %v114_v26  ;;  %967 = vmatpush3.msra.mxu1 %v293_v33 }
  0x5e   :  { %915 = vmatpush3.msra.mxu0 %v114_v26  ;;  %968 = vmatprep.subr.mxu1 %v292_v46 }
  0x5f   :  { %917 = vmatmul.mubr.f32.vlgmr.msra.gmra.mxu0 %v99_v28  ;;  %969 = vmatpush3.msra.mxu1 %v292_v46 }
  0x60   :  { %919 = vmatprep.mubr.f32.mxu0 %v100_v30  ;;  %970 = vmatprep.subr.mxu1 %v291_v47 }
  0x61   :  { %971 = vmatpush3.msra.mxu1 %v291_v47  ;;  %996 = vmatprep.subr.mxu0 %v483_v48 }
  0x62   :  { %1052 = vmatprep.subr.mxu1 %v483_v48  ;;  %997 = vmatpush3.msra.mxu0 %v483_v48 }
  0x63   :  { %920 = vmatmul.mubr.f32.gmra.mxu0 %v101_v32  ;;  %998 = vmatprep.subr.mxu0 %v482_v49 }
  0x64   :  { %922 = vmatprep.mubr.f32.mxu0 %v102_v34  ;;  %999 = vmatpush3.msra.mxu0 %v482_v49 }
  0x65   :  { %1000 = vmatprep.subr.mxu0 %v481_v50 }
  0x66   :  { %1001 = vmatpush3.msra.mxu0 %v481_v50 }
  0x67   :  { %923 = vmatmul.mubr.f32.gmra.mxu0 %v103_v35  ;;  %1002 = vmatprep.subr.mxu0 %v480_v51 }
  0x68   :  { %925 = vmatprep.mubr.f32.mxu0 %v104_v36  ;;  %1003 = vmatpush3.msra.mxu0 %v480_v51 }
  0x69   :  { %1004 = vmatprep.subr.mxu0 %v479_v52 }
  0x6a   :  { %1005 = vmatpush3.msra.mxu0 %v479_v52 }
  0x6b   :  { %926 = vmatmul.mubr.f32.gmra.mxu0 %v105_v37  ;;  %1006 = vmatprep.subr.mxu0 %v1378_v53 }
  0x6c   :  { %928 = vmatprep.mubr.f32.mxu0 %v106_v38  ;;  %1007 = vmatpush3.msra.mxu0 %v1378_v53 }
  0x6d   :  { %1008 = vmatprep.subr.mxu0 %v1380_v54 }
  0x6e   :  { %1009 = vmatpush3.msra.mxu0 %v1380_v54 }
  0x6f   :  { %929 = vmatmul.mubr.f32.gmra.mxu0 %v107_v39  ;;  %1010 = vmatprep.subr.mxu0 %v1384_v55 }
  0x70   :  { %931 = vmatprep.mubr.f32.mxu0 %v108_v40  ;;  %1011 = vmatpush3.msra.mxu0 %v1384_v55 }
  0x71   :  { %1012 = vmatprep.subr.mxu0 %v1388_v56 }
  0x72   :  { %1013 = vmatpush3.msra.mxu0 %v1388_v56 }
  0x73   :  { %932 = vmatmul.mubr.f32.gmra.mxu0 %v109_v41  ;;  %1014 = vmatprep.subr.mxu0 %v1392_v57 }
  0x74   :  { %934 = vmatprep.mubr.f32.mxu0 %v110_v42  ;;  %1015 = vmatpush3.msra.mxu0 %v1392_v57 }
  0x75   :  { %1016 = vmatprep.subr.mxu0 %v1396_v58 }
  0x76   :  { %1017 = vmatpush3.msra.mxu0 %v1396_v58 }
  0x77   :  { %935 = vmatmul.mubr.f32.gmra.mxu0 %v111_v43  ;;  %1018 = vmatprep.subr.mxu0 %v1400_v59 }
  0x78   :  { %937 = vmatprep.mubr.f32.mxu0 %v112_v44  ;;  %1019 = vmatpush3.msra.mxu0 %v1400_v59 }
  0x79   :  { %1020 = vmatprep.subr.mxu0 %v1404_v60 }
  0x7a   :  { %1021 = vmatpush3.msra.mxu0 %v1404_v60 }
  0x7b   :  { %938 = vmatmul.mubr.f32.gmra.mxu0 %v113_v45  ;;  %1022 = vmatprep.subr.mxu0 %v1408_v61 }
  0x7c   :  { %1023 = vmatpush3.msra.mxu0 %v1408_v61 }
  0x7d   :  { %1024 = vmatprep.subr.mxu0 %v1412_v62 }
  0x7e   :  { %1025 = vmatpush3.msra.mxu0 %v1412_v62 }
  0x7f   :  { %1026 = vmatprep.subr.mxu0 %v468_v15 }
  0x80   :  { %1027 = vmatpush3.msra.mxu0 %v468_v15 }
 0x11f   :  { %v918_v63 = vpop.f32.mrf.mxu0 }
 0x120   :  { %276 = vst [vmem:[#allocation11 + $0x8] sm:$0xff] %v918_v63 }
 0x121   :  { %v196_v0 = vpop.f32.mrf.mxu0 }
 0x122   :  { %275 = vst [vmem:[#allocation11] sm:$0xff] %v196_v0  ;;  %972 = vmatprep.mubr.f32.mxu1 %v196_v0 }
 0x123   :  { %v921_v1 = vpop.f32.mrf.mxu0  ;;  %973 = vmatmul.mubr.f32.vlgmr.msra.gmra.mxu1 %v918_v63 }
 0x124   :  { %278 = vst [vmem:[#allocation11 + $0x18] sm:$0xff] %v921_v1  ;;  %1068 = vmatpush3.msra.mxu1 %v483_v48 }
 0x125   :  { %v206_v2 = vpop.f32.mrf.mxu0  ;;  %1053 = vmatprep.subr.mxu1 %v482_v49 }
 0x126   :  { %277 = vst [vmem:[#allocation11 + $0x10] sm:$0xff] %v206_v2  ;;  %975 = vmatprep.mubr.f32.mxu1 %v206_v2  ;;  %1069 = vmatpush3.msra.mxu1 %v482_v49 }
 0x127   :  { %v924_v3 = vpop.f32.mrf.mxu0  ;;  %976 = vmatmul.mubr.f32.gmra.mxu1 %v921_v1  ;;  %1054 = vmatprep.subr.mxu1 %v481_v50 }
 0x128   :  { %280 = vst [vmem:[#allocation11 + $0x28] sm:$0xff] %v924_v3  ;;  %1070 = vmatpush3.msra.mxu1 %v481_v50 }
 0x129   :  { %v216_v4 = vpop.f32.mrf.mxu0  ;;  %1055 = vmatprep.subr.mxu1 %v480_v51 }
 0x12a   :  { %279 = vst [vmem:[#allocation11 + $0x20] sm:$0xff] %v216_v4  ;;  %978 = vmatprep.mubr.f32.mxu1 %v216_v4  ;;  %1071 = vmatpush3.msra.mxu1 %v480_v51 }
 0x12b   :  { %v927_v5 = vpop.f32.mrf.mxu0  ;;  %979 = vmatmul.mubr.f32.gmra.mxu1 %v924_v3  ;;  %1056 = vmatprep.subr.mxu1 %v479_v52 }
 0x12c   :  { %282 = vst [vmem:[#allocation11 + $0x38] sm:$0xff] %v927_v5  ;;  %1072 = vmatpush3.msra.mxu1 %v479_v52 }
 0x12d   :  { %v226_v6 = vpop.f32.mrf.mxu0  ;;  %1057 = vmatprep.subr.mxu1 %v1378_v53 }
 0x12e   :  { %281 = vst [vmem:[#allocation11 + $0x30] sm:$0xff] %v226_v6  ;;  %981 = vmatprep.mubr.f32.mxu1 %v226_v6  ;;  %1073 = vmatpush3.msra.mxu1 %v1378_v53 }
 0x12f   :  { %v930_v7 = vpop.f32.mrf.mxu0  ;;  %982 = vmatmul.mubr.f32.gmra.mxu1 %v927_v5  ;;  %1058 = vmatprep.subr.mxu1 %v1380_v54 }
 0x130   :  { %284 = vst [vmem:[#allocation11 + $0x48] sm:$0xff] %v930_v7  ;;  %1074 = vmatpush3.msra.mxu1 %v1380_v54 }
 0x131   :  { %v236_v8 = vpop.f32.mrf.mxu0  ;;  %1059 = vmatprep.subr.mxu1 %v1384_v55 }
 0x132   :  { %283 = vst [vmem:[#allocation11 + $0x40] sm:$0xff] %v236_v8  ;;  %984 = vmatprep.mubr.f32.mxu1 %v236_v8  ;;  %1075 = vmatpush3.msra.mxu1 %v1384_v55 }
 0x133   :  { %v933_v9 = vpop.f32.mrf.mxu0  ;;  %985 = vmatmul.mubr.f32.gmra.mxu1 %v930_v7  ;;  %1060 = vmatprep.subr.mxu1 %v1388_v56 }
 0x134   :  { %286 = vst [vmem:[#allocation11 + $0x58] sm:$0xff] %v933_v9  ;;  %1076 = vmatpush3.msra.mxu1 %v1388_v56 }
 0x135   :  { %v246_v10 = vpop.f32.mrf.mxu0  ;;  %1061 = vmatprep.subr.mxu1 %v1392_v57 }
 0x136   :  { %285 = vst [vmem:[#allocation11 + $0x50] sm:$0xff] %v246_v10  ;;  %987 = vmatprep.mubr.f32.mxu1 %v246_v10  ;;  %1077 = vmatpush3.msra.mxu1 %v1392_v57 }
 0x137   :  { %v936_v11 = vpop.f32.mrf.mxu0  ;;  %988 = vmatmul.mubr.f32.gmra.mxu1 %v933_v9  ;;  %1062 = vmatprep.subr.mxu1 %v1396_v58 }
 0x138   :  { %288 = vst [vmem:[#allocation11 + $0x68] sm:$0xff] %v936_v11  ;;  %1078 = vmatpush3.msra.mxu1 %v1396_v58 }
 0x139   :  { %v256_v12 = vpop.f32.mrf.mxu0  ;;  %1063 = vmatprep.subr.mxu1 %v1400_v59 }
 0x13a   :  { %287 = vst [vmem:[#allocation11 + $0x60] sm:$0xff] %v256_v12  ;;  %990 = vmatprep.mubr.f32.mxu1 %v256_v12  ;;  %1079 = vmatpush3.msra.mxu1 %v1400_v59 }
 0x13b   :  { %v939_v13 = vpop.f32.mrf.mxu0  ;;  %991 = vmatmul.mubr.f32.gmra.mxu1 %v936_v11  ;;  %1064 = vmatprep.subr.mxu1 %v1404_v60 }
 0x13c   :  { %290 = vst [vmem:[#allocation11 + $0x78] sm:$0xff] %v939_v13  ;;  %1080 = vmatpush3.msra.mxu1 %v1404_v60 }
 0x13d   :  { %v266_v14 = vpop.f32.mrf.mxu0  ;;  %1065 = vmatprep.subr.mxu1 %v1408_v61 }
 0x13e   :  { %289 = vst [vmem:[#allocation11 + $0x70] sm:$0xff] %v266_v14  ;;  %993 = vmatprep.mubr.f32.mxu1 %v266_v14  ;;  %1081 = vmatpush3.msra.mxu1 %v1408_v61 }
 0x13f   :  { %994 = vmatmul.mubr.f32.gmra.mxu1 %v939_v13  ;;  %1066 = vmatprep.subr.mxu1 %v1412_v62 }
 0x140   :  { %1082 = vmatpush3.msra.mxu1 %v1412_v62 }
 0x141   :  { %1067 = vmatprep.subr.mxu1 %v468_v15 }
 0x142   :  { %1083 = vmatpush3.msra.mxu1 %v468_v15 }
 0x1e3   :  { %v974_v16 = vpop.f32.mrf.mxu1 }
 0x1e4   :  { %453 = vst [vmem:[#allocation12 + $0x8] sm:$0xff] %v974_v16 }
 0x1e5   :  { %v373_v17 = vpop.f32.mrf.mxu1 }
 0x1e6   :  { %452 = vst [vmem:[#allocation12] sm:$0xff] %v373_v17  ;;  %1028 = vmatprep.mubr.f32.mxu0 %v373_v17 }
 0x1e7   :  { %v977_v18 = vpop.f32.mrf.mxu1  ;;  %1029 = vmatmul.mubr.f32.vlgmr.msra.gmra.mxu0 %v974_v16 }
 0x1e8   :  { %455 = vst [vmem:[#allocation12 + $0x18] sm:$0xff] %v977_v18 }
 0x1e9   :  { %v383_v19 = vpop.f32.mrf.mxu1 }
 0x1ea   :  { %454 = vst [vmem:[#allocation12 + $0x10] sm:$0xff] %v383_v19  ;;  %1031 = vmatprep.mubr.f32.mxu0 %v383_v19 }
 0x1eb   :  { %v980_v20 = vpop.f32.mrf.mxu1  ;;  %1032 = vmatmul.mubr.f32.gmra.mxu0 %v977_v18 }
 0x1ec   :  { %457 = vst [vmem:[#allocation12 + $0x28] sm:$0xff] %v980_v20 }
 0x1ed   :  { %v393_v21 = vpop.f32.mrf.mxu1 }
 0x1ee   :  { %456 = vst [vmem:[#allocation12 + $0x20] sm:$0xff] %v393_v21  ;;  %1034 = vmatprep.mubr.f32.mxu0 %v393_v21 }
 0x1ef   :  { %v983_v22 = vpop.f32.mrf.mxu1  ;;  %1035 = vmatmul.mubr.f32.gmra.mxu0 %v980_v20 }
 0x1f0   :  { %459 = vst [vmem:[#allocation12 + $0x38] sm:$0xff] %v983_v22 }
 0x1f1   :  { %v403_v23 = vpop.f32.mrf.mxu1 }
 0x1f2   :  { %458 = vst [vmem:[#allocation12 + $0x30] sm:$0xff] %v403_v23  ;;  %1037 = vmatprep.mubr.f32.mxu0 %v403_v23 }
 0x1f3   :  { %v986_v24 = vpop.f32.mrf.mxu1  ;;  %1038 = vmatmul.mubr.f32.gmra.mxu0 %v983_v22 }
 0x1f4   :  { %461 = vst [vmem:[#allocation12 + $0x48] sm:$0xff] %v986_v24 }
 0x1f5   :  { %v413_v25 = vpop.f32.mrf.mxu1 }
 0x1f6   :  { %460 = vst [vmem:[#allocation12 + $0x40] sm:$0xff] %v413_v25  ;;  %1040 = vmatprep.mubr.f32.mxu1 %v413_v25 }
 0x1f7   :  { %v989_v26 = vpop.f32.mrf.mxu1  ;;  %1041 = vmatmul.mubr.f32.vlgmr.msra.gmra.mxu1 %v986_v24 }
 0x1f8   :  { %463 = vst [vmem:[#allocation12 + $0x58] sm:$0xff] %v989_v26 }
 0x1f9   :  { %v423_v27 = vpop.f32.mrf.mxu1 }
 0x1fa   :  { %462 = vst [vmem:[#allocation12 + $0x50] sm:$0xff] %v423_v27  ;;  %1043 = vmatprep.mubr.f32.mxu1 %v423_v27 }
 0x1fb   :  { %v992_v28 = vpop.f32.mrf.mxu1  ;;  %1044 = vmatmul.mubr.f32.gmra.mxu1 %v989_v26 }
 0x1fc   :  { %465 = vst [vmem:[#allocation12 + $0x68] sm:$0xff] %v992_v28 }
 0x1fd   :  { %v433_v29 = vpop.f32.mrf.mxu1 }
 0x1fe   :  { %464 = vst [vmem:[#allocation12 + $0x60] sm:$0xff] %v433_v29  ;;  %1046 = vmatprep.mubr.f32.mxu1 %v433_v29 }
 0x1ff   :  { %v995_v30 = vpop.f32.mrf.mxu1  ;;  %1047 = vmatmul.mubr.f32.gmra.mxu1 %v992_v28 }
 0x200   :  { %467 = vst [vmem:[#allocation12 + $0x78] sm:$0xff] %v995_v30 }
 0x201   :  { %v443_v31 = vpop.f32.mrf.mxu1 }
 0x202   :  { %466 = vst [vmem:[#allocation12 + $0x70] sm:$0xff] %v443_v31  ;;  %1049 = vmatprep.mubr.f32.mxu1 %v443_v31 }
 0x203   :  { %1050 = vmatmul.mubr.f32.gmra.mxu1 %v995_v30 }
 0x204   :  { %1206 = shalt.err (!%p1203_p1)
}
 0x205   :  { %746 = dma.vmem_to_hbm [thread:$0]  %s741_s5, 2048, %s1487_s7, [#allocation13], %s1289_s14, %s1289_s14, %s1290_s15  }
 0x206   :  { %s1215_s19 = scalar_lea.vmem %s729_s13, 2048  ;;  %p1220_p3 = scmp.lt.s32.totalorder %s729_s13, %s729_s13 }
 0x207   :  { %p1216_p2 = scmp.ne.s32.totalorder %s729_s13, %s1215_s19  ;;  %p1221_p4 = scmp.lt.s32.totalorder %s1215_s19, %s1215_s19 }
 0x209   :  { %p1222_p5 = por %p1221_p4, %p1220_p3 }
 0x20b   :  { %p1223_p6 = pnand %p1222_p5, %p1216_p2 }
 0x20d   :  { %1226 = shalt.err (!%p1223_p6)
}
 0x20e   :  { %734 = dma.vmem_to_hbm [thread:$0]  %s729_s13, 2048, %s1486_s6, [#allocation4], %s1289_s14, %s1289_s14, %s1290_s15   ;;  %v653_v35 = vld [vmem:[#allocation10 + $0x8] sm:$0xff]  ;;  %v652_v37 = vld [vmem:[#allocation10] sm:$0xff]  ;;  %v655_v43 = vld [vmem:[#allocation10 + $0x18] sm:$0xff] }
 0x20f   :  { %v1453_v32 = vld [vmem:[%s1484_s4] ss:$0 sm:$0xff]  ;;  %v654_v45 = vld [vmem:[#allocation10 + $0x10] sm:$0xff]  ;;  %v657_v53 = vld [vmem:[#allocation10 + $0x28] sm:$0xff]  ;;  %s1296_s4 = smov [#allocation14]  }
 0x210   :  { %v656_v55 = vld [vmem:[#allocation10 + $0x20] sm:$0xff]  ;;  %v659_v1 = vld [vmem:[#allocation10 + $0x38] sm:$0xff]  ;;  %v658_v3 = vld [vmem:[#allocation10 + $0x30] sm:$0xff]  ;;  %s752_s6 = sshll.u32 %s1296_s4, 4  ;;  %s753_s6 = int_to_ptr.vmem [resolvable:$true] %s752_s6 }
 0x211   :  { %v661_v13 = vld [vmem:[#allocation10 + $0x48] sm:$0xff]  ;;  %v660_v15 = vld [vmem:[#allocation10 + $0x40] sm:$0xff]  ;;  %v663_v25 = vld [vmem:[#allocation10 + $0x58] sm:$0xff]  ;;  %s1235_s7 = scalar_lea.vmem %s753_s6, 2048  ;;  %p1240_p8 = scmp.lt.s32.totalorder %s753_s6, %s753_s6 }
 0x212   :  { %v662_v27 = vld [vmem:[#allocation10 + $0x50] sm:$0xff]  ;;  %p1236_p7 = scmp.ne.s32.totalorder %s753_s6, %s1235_s7  ;;  %p1241_p9 = scmp.lt.s32.totalorder %s1235_s7, %s1235_s7 }
 0x214   :  { %p1242_p10 = por %p1241_p9, %p1240_p8 }
 0x216   :  { %p1243_p11 = pnand %p1242_p10, %p1236_p7 }
 0x2a7   :  { %v1030_v33 = vpop.f32.mrf.mxu0 }
 0x2a8   :  { %v563_v34 = vadd.f32 %v1030_v33, %v1453_v32 }
 0x2a9   :  { %v557_v36 = vpop.f32.mrf.mxu0 }
 0x2aa   :  { %637 = vst [vmem:[#allocation14 + $0x8] sm:$0xff] %v563_v34  ;;  %v558_v38 = vadd.f32 %v1453_v32, %v557_v36  ;;  %v669_v40 = vsub.f32 %v563_v34, %v653_v35 }
 0x2ab   :  { %v1033_v39 = vpop.f32.mrf.mxu0 }
 0x2ac   :  { %636 = vst [vmem:[#allocation14] sm:$0xff] %v558_v38  ;;  %v668_v41 = vsub.f32 %v558_v38, %v652_v37  ;;  %v573_v42 = vadd.f32 %v1033_v39, %v1453_v32  ;;  %v685_v50 = vmul.f32 %v669_v40, %v669_v40  ;;  %v665_v38 = vld [vmem:[#allocation10 + $0x68] sm:$0xff]  ;;  %v664_v40 = vld [vmem:[#allocation10 + $0x60] sm:$0xff] }
 0x2ad   :  { %v567_v44 = vpop.f32.mrf.mxu0 }
 0x2ae   :  { %v684_v46 = vmul.f32 %v668_v41, %v668_v41  ;;  %639 = vst [vmem:[#allocation14 + $0x18] sm:$0xff] %v573_v42  ;;  %v568_v47 = vadd.f32 %v1453_v32, %v567_v44  ;;  %v671_v48 = vsub.f32 %v573_v42, %v655_v43 }
 0x2af   :  { %v1036_v49 = vpop.f32.mrf.mxu0 }
 0x2b0   :  { %638 = vst [vmem:[#allocation14 + $0x10] sm:$0xff] %v568_v47  ;;  %v670_v51 = vsub.f32 %v568_v47, %v654_v45  ;;  %v583_v52 = vadd.f32 %v1036_v49, %v1453_v32  ;;  %v700_v56 = vadd.f32 %v685_v50, %v684_v46  ;;  %v687_v59 = vmul.f32 %v671_v48, %v671_v48  ;;  %v667_v50 = vld [vmem:[#allocation10 + $0x78] sm:$0xff] }
 0x2b1   :  { %v577_v54 = vpop.f32.mrf.mxu0 }
 0x2b2   :  { %v686_v57 = vmul.f32 %v670_v51, %v670_v51  ;;  %641 = vst [vmem:[#allocation14 + $0x28] sm:$0xff] %v583_v52  ;;  %v578_v58 = vadd.f32 %v1453_v32, %v577_v54  ;;  %v673_v62 = vsub.f32 %v583_v52, %v657_v53  ;;  %v666_v52 = vld [vmem:[#allocation10 + $0x70] sm:$0xff] }
 0x2b3   :  { %v1039_v60 = vpop.f32.mrf.mxu0 }
 0x2b4   :  { %v701_v61 = vadd.f32 %v700_v56, %v686_v57  ;;  %640 = vst [vmem:[#allocation14 + $0x20] sm:$0xff] %v578_v58  ;;  %v672_v63 = vsub.f32 %v578_v58, %v656_v55  ;;  %v593_v0 = vadd.f32 %v1039_v60, %v1453_v32  ;;  %v689_v9 = vmul.f32 %v673_v62, %v673_v62 }
 0x2b5   :  { %v587_v2 = vpop.f32.mrf.mxu0 }
 0x2b6   :  { %v688_v4 = vmul.f32 %v672_v63, %v672_v63  ;;  %v702_v5 = vadd.f32 %v701_v61, %v687_v59  ;;  %643 = vst [vmem:[#allocation14 + $0x38] sm:$0xff] %v593_v0  ;;  %v588_v6 = vadd.f32 %v1453_v32, %v587_v2  ;;  %v675_v7 = vsub.f32 %v593_v0, %v659_v1 }
 0x2b7   :  { %v1042_v8 = vpop.f32.mrf.mxu1 }
 0x2b8   :  { %v703_v10 = vadd.f32 %v702_v5, %v688_v4  ;;  %642 = vst [vmem:[#allocation14 + $0x30] sm:$0xff] %v588_v6  ;;  %v674_v11 = vsub.f32 %v588_v6, %v658_v3  ;;  %v603_v12 = vadd.f32 %v1042_v8, %v1453_v32  ;;  %v691_v19 = vmul.f32 %v675_v7, %v675_v7 }
 0x2b9   :  { %v597_v14 = vpop.f32.mrf.mxu1 }
 0x2ba   :  { %v690_v16 = vmul.f32 %v674_v11, %v674_v11  ;;  %v704_v17 = vadd.f32 %v703_v10, %v689_v9  ;;  %645 = vst [vmem:[#allocation14 + $0x48] sm:$0xff] %v603_v12  ;;  %v598_v18 = vadd.f32 %v1453_v32, %v597_v14  ;;  %v677_v22 = vsub.f32 %v603_v12, %v661_v13 }
 0x2bb   :  { %v1045_v20 = vpop.f32.mrf.mxu1 }
 0x2bc   :  { %v705_v21 = vadd.f32 %v704_v17, %v690_v16  ;;  %644 = vst [vmem:[#allocation14 + $0x40] sm:$0xff] %v598_v18  ;;  %v676_v23 = vsub.f32 %v598_v18, %v660_v15  ;;  %v613_v24 = vadd.f32 %v1045_v20, %v1453_v32  ;;  %v693_v34 = vmul.f32 %v677_v22, %v677_v22 }
 0x2bd   :  { %v607_v26 = vpop.f32.mrf.mxu1 }
 0x2be   :  { %v692_v28 = vmul.f32 %v676_v23, %v676_v23  ;;  %v706_v29 = vadd.f32 %v705_v21, %v691_v19  ;;  %647 = vst [vmem:[#allocation14 + $0x58] sm:$0xff] %v613_v24  ;;  %v608_v30 = vadd.f32 %v1453_v32, %v607_v26  ;;  %v679_v31 = vsub.f32 %v613_v24, %v663_v25 }
 0x2bf   :  { %v1048_v33 = vpop.f32.mrf.mxu1 }
 0x2c0   :  { %v707_v35 = vadd.f32 %v706_v29, %v692_v28  ;;  %646 = vst [vmem:[#allocation14 + $0x50] sm:$0xff] %v608_v30  ;;  %v678_v36 = vsub.f32 %v608_v30, %v662_v27  ;;  %v623_v37 = vadd.f32 %v1048_v33, %v1453_v32  ;;  %v695_v44 = vmul.f32 %v679_v31, %v679_v31 }
 0x2c1   :  { %v617_v39 = vpop.f32.mrf.mxu1 }
 0x2c2   :  { %v694_v41 = vmul.f32 %v678_v36, %v678_v36  ;;  %v708_v42 = vadd.f32 %v707_v35, %v693_v34  ;;  %649 = vst [vmem:[#allocation14 + $0x68] sm:$0xff] %v623_v37  ;;  %v618_v43 = vadd.f32 %v1453_v32, %v617_v39  ;;  %v681_v47 = vsub.f32 %v623_v37, %v665_v38 }
 0x2c3   :  { %v1051_v45 = vpop.f32.mrf.mxu1 }
 0x2c4   :  { %v709_v46 = vadd.f32 %v708_v42, %v694_v41  ;;  %648 = vst [vmem:[#allocation14 + $0x60] sm:$0xff] %v618_v43  ;;  %v680_v48 = vsub.f32 %v618_v43, %v664_v40  ;;  %v633_v49 = vadd.f32 %v1051_v45, %v1453_v32  ;;  %v697_v56 = vmul.f32 %v681_v47, %v681_v47 }
 0x2c5   :  { %v627_v51 = vpop.f32.mrf.mxu1 }
 0x2c6   :  { %v696_v53 = vmul.f32 %v680_v48, %v680_v48  ;;  %v710_v54 = vadd.f32 %v709_v46, %v695_v44  ;;  %651 = vst [vmem:[#allocation14 + $0x78] sm:$0xff] %v633_v49  ;;  %v628_v55 = vadd.f32 %v1453_v32, %v627_v51  ;;  %v683_v58 = vsub.f32 %v633_v49, %v667_v50 }
 0x2c8   :  { %v711_v57 = vadd.f32 %v710_v54, %v696_v53  ;;  %650 = vst [vmem:[#allocation14 + $0x70] sm:$0xff] %v628_v55  ;;  %v682_v59 = vsub.f32 %v628_v55, %v666_v52 }
 0x2c9   :  { %1246 = shalt.err (!%p1243_p11)
}
 0x2ca   :  { %758 = dma.vmem_to_hbm [thread:$0]  %s753_s6, 2048, %s1488_s8, [#allocation13], %s1289_s14, %s1289_s14, %s1290_s15   ;;  %v698_v32 = vmul.f32 %v682_v59, %v682_v59  ;;  %v712_v60 = vadd.f32 %v711_v57, %v697_v56  ;;  %v699_v61 = vmul.f32 %v683_v58, %v683_v58 }
 0x2cb   :  { %s1297_s25 = smov [#allocation15]  }
 0x2cc   :  { %v713_v62 = vadd.f32 %v712_v60, %v698_v32  ;;  %s765_s26 = sshll.u32 %s1297_s25, 4  ;;  %s766_s26 = int_to_ptr.vmem [resolvable:$true] %s765_s26 }
 0x2cd   :  { %s1255_s3 = scalar_lea.vmem %s766_s26, 16  ;;  %s1259_s27 = scalar_lea.vmem %s766_s26, 32 }
 0x2ce   :  { %v714_v63 = vadd.f32 %v713_v62, %v699_v61  ;;  %p1256_p12 = scmp.ne.s32.totalorder %s766_s26, %s1255_s3  ;;  %p1260_p13 = scmp.lt.s32.totalorder %s766_s26, %s766_s26 }
 0x2cf   :  { %p1261_p0 = scmp.lt.s32.totalorder %s1259_s27, %s1255_s3 }
 0x2d0   :  { %v715_v0 = vrot.slane %v714_v63, 4 }
 0x2d1   :  { %p1262_p1 = por %p1261_p0, %p1260_p13 }
 0x2d2   :  { %v716_v1 = vadd.f32 %v715_v0, %v714_v63 }
 0x2d3   :  { %p1263_p2 = pnand %p1262_p1, %p1256_p12 }
 0x2d4   :  { %v717_v2 = vrot.slane %v716_v1, 2 }
 0x2d6   :  { %v718_v3 = vadd.f32 %v717_v2, %v716_v1 }
 0x2d8   :  { %v719_v4 = vrot.slane %v718_v3, 1 }
 0x2da   :  { %v720_v5 = vadd.f32 %v719_v4, %v718_v3 }
 0x2dc   :  { %v721_v6 = vmul.f32 0.00390625, %v720_v5 }
 0x2de   :  { %722 = vst [vmem:[#allocation15] sm:$0x1] %v721_v6 }
 0x2df   :  { %1266 = shalt.err (!%p1263_p2)
}
 0x2e0   :  { %768 = dma.vmem_to_hbm [thread:$0]  %s766_s26, 16, %s1489_s9, [#allocation16]  }
 0x2e1   :  { %1281 = dma.done.wait [#allocation4], 2048  }
 0x2e2   :  { %1282 = vsyncadd [#allocation4], 4294965248 }
 0x2e3   :  { %1283 = dma.done.wait [#allocation13], 4096  }
 0x2e4   :  { %1284 = vsyncadd [#allocation13], 4294963200 }
 0x2e5   :  { %1285 = dma.done.wait [#allocation16], 16  }
 0x2e6   :  { %1286 = vsyncadd [#allocation16], 4294967280 }
 0x2e7   :  { %781 = vsyncpa [#allocation3], 1 }
 0x2e8   :  { %782 = vsyncpa [#allocation6], 1 }
 0x2e9   :  { %783 = vsyncpa [#allocation9], 1 }
 0x2ea   :  { %784 = vsyncpa [#allocation4], 1 }
 0x2eb   :  { %785 = vsyncpa [#allocation13], 1 }
 0x2ec   :  { %786 = vsyncpa [#allocation16], 1 }

// kernel: tpu_custom_call.1
= control target key start
LH: loop header
LB: loop body
LE: loop exit
PB: predicated region body
PF: predicated region fallthrough
CT: control target
= control target key end

     0   :  { %15 = vsyncpa [#allocation3], 0  ;;  %s1480_s0 = inlined_call_operand.hbm [shape: f32[128,128], index: 0, kind: input, shape index: {}]   ;;  %s1481_s1 = inlined_call_operand.hbm [shape: f32[128,128], index: 1, kind: input, shape index: {}]   ;;  %s1482_s2 = inlined_call_operand.hbm [shape: f32[128,128], index: 2, kind: input, shape index: {}]   ;;  %s1483_s3 = inlined_call_operand.hbm [shape: f32[128,128], index: 3, kind: input, shape index: {}]   ;;  %s1484_s4 = inlined_call_operand.vmem [shape: f32[1,128], index: 4, kind: input, shape index: {}]   ;;  %s1485_s5 = inlined_call_operand.hbm [shape: f32[128,128], index: 5, kind: input, shape index: {}]   ;;  %s1486_s6 = inlined_call_operand.hbm [shape: f32[128,128], index: 6, kind: output, shape index: {0}]   ;;  %s1487_s7 = inlined_call_operand.hbm [shape: f32[128,128], index: 7, kind: output, shape index: {1}]   ;;  %s1488_s8 = inlined_call_operand.hbm [shape: f32[128,128], index: 8, kind: output, shape index: {2}]   ;;  %s1489_s9 = inlined_call_operand.hbm [shape: f32[1,1,128], index: 9, kind: output, shape index: {3}]  }
   0x1   :  { %16 = vsyncpa [#allocation6], 0 }
   0x2   :  { %17 = vsyncpa [#allocation9], 0 }
   0x3   :  { %18 = vsyncpa [#allocation4], 0 }
   0x4   :  { %19 = vsyncpa [#allocation13], 0 }
   0x5   :  { %20 = vsyncpa [#allocation16], 0  ;;  %s1287_s30 = smov [#allocation5]   ;;  %s1288_s11 = smov [#allocation8]  }
   0x6   :  { %s38_s10 = sshll.u32 %s1287_s30, 4  ;;  %s62_s12 = sshll.u32 %s1288_s11, 4  ;;  %s39_s10 = int_to_ptr.vmem [resolvable:$true] %s38_s10  ;;  %s63_s12 = int_to_ptr.vmem [resolvable:$true] %s62_s12 }
   0x7   :  { %s1103_s13 = scalar_lea.vmem %s39_s10, 2048  ;;  %p1108_p1 = scmp.lt.s32.totalorder %s39_s10, %s39_s10 }
   0x8   :  { %p1104_p0 = scmp.ne.s32.totalorder %s39_s10, %s1103_s13  ;;  %p1109_p2 = scmp.lt.s32.totalorder %s1103_s13, %s1103_s13 }
   0xa   :  { %p1110_p3 = por %p1109_p2, %p1108_p1 }
   0xc   :  { %p1111_p4 = pnand %p1110_p3, %p1104_p0 }
   0xe   :  { %1114 = shalt.err (!%p1111_p4)
}
   0xf   :  { %s1289_s14 = smov 128   ;;  %s1290_s15 = smov 8  }
  0x10   :  { %44 = dma.hbm_to_vmem [thread:$0]  %s1481_s1, 2048, %s39_s10, [#allocation6], %s1289_s14, %s1289_s14, %s1290_s15  }
  0x11   :  { %s1123_s18 = scalar_lea.vmem %s63_s12, 2048  ;;  %p1128_p6 = scmp.lt.s32.totalorder %s63_s12, %s63_s12 }
  0x12   :  { %p1124_p5 = scmp.ne.s32.totalorder %s63_s12, %s1123_s18  ;;  %p1129_p7 = scmp.lt.s32.totalorder %s1123_s18, %s1123_s18 }
  0x14   :  { %p1130_p8 = por %p1129_p7, %p1128_p6 }
  0x16   :  { %p1131_p9 = pnand %p1130_p8, %p1124_p5 }
  0x18   :  { %1134 = shalt.err (!%p1131_p9)
}
  0x19   :  { %68 = dma.hbm_to_vmem [thread:$0]  %s1483_s3, 2048, %s63_s12, [#allocation9], %s1289_s14, %s1289_s14, %s1290_s15  }
  0x1a   :  { %s1291_s21 = smov [#allocation2]   ;;  %s1292_s23 = smov [#allocation7]  }
  0x1b   :  { %s26_s22 = sshll.u32 %s1291_s21, 4  ;;  %s50_s24 = sshll.u32 %s1292_s23, 4  ;;  %s27_s22 = int_to_ptr.vmem [resolvable:$true] %s26_s22  ;;  %s51_s24 = int_to_ptr.vmem [resolvable:$true] %s50_s24 }
  0x1c   :  { %s1143_s1 = scalar_lea.vmem %s27_s22, 2048  ;;  %p1148_p11 = scmp.lt.s32.totalorder %s27_s22, %s27_s22 }
  0x1d   :  { %p1144_p10 = scmp.ne.s32.totalorder %s27_s22, %s1143_s1  ;;  %p1149_p12 = scmp.lt.s32.totalorder %s1143_s1, %s1143_s1 }
  0x1f   :  { %p1150_p13 = por %p1149_p12, %p1148_p11 }
  0x21   :  { %p1151_p0 = pnand %p1150_p13, %p1144_p10 }
  0x23   :  { %1154 = shalt.err (!%p1151_p0)
}
  0x24   :  { %32 = dma.hbm_to_vmem [thread:$0]  %s1480_s0, 2048, %s27_s22, [#allocation3], %s1289_s14, %s1289_s14, %s1290_s15  }
  0x25   :  { %s1163_s3 = scalar_lea.vmem %s51_s24, 2048  ;;  %p1168_p2 = scmp.lt.s32.totalorder %s51_s24, %s51_s24 }
  0x26   :  { %p1164_p1 = scmp.ne.s32.totalorder %s51_s24, %s1163_s3  ;;  %p1169_p3 = scmp.lt.s32.totalorder %s1163_s3, %s1163_s3 }
  0x28   :  { %p1170_p4 = por %p1169_p3, %p1168_p2 }
  0x2a   :  { %p1171_p5 = pnand %p1170_p4, %p1164_p1 }
  0x2c   :  { %1174 = shalt.err (!%p1171_p5)
}
  0x2d   :  { %56 = dma.hbm_to_vmem [thread:$0]  %s1482_s2, 2048, %s51_s24, [#allocation6], %s1289_s14, %s1289_s14, %s1290_s15  }
  0x2e   :  { %s1293_s29 = smov [#allocation10]  }
  0x2f   :  { %s76_s30 = sshll.u32 %s1293_s29, 4  ;;  %s77_s30 = int_to_ptr.vmem [resolvable:$true] %s76_s30 }
  0x30   :  { %s1183_s10 = scalar_lea.vmem %s77_s30, 2048  ;;  %p1188_p7 = scmp.lt.s32.totalorder %s77_s30, %s77_s30 }
  0x31   :  { %p1184_p6 = scmp.ne.s32.totalorder %s77_s30, %s1183_s10  ;;  %p1189_p8 = scmp.lt.s32.totalorder %s1183_s10, %s1183_s10 }
  0x33   :  { %p1190_p9 = por %p1189_p8, %p1188_p7 }
  0x35   :  { %p1191_p10 = pnand %p1190_p9, %p1184_p6 }
  0x37   :  { %1194 = shalt.err (!%p1191_p10)
}
  0x38   :  { %82 = dma.hbm_to_vmem [thread:$0]  %s1485_s5, 2048, %s77_s30, [#allocation9], %s1289_s14, %s1289_s14, %s1290_s15  }
  0x39   :  { %1275 = dma.done.wait [#allocation3], 2048  }
  0x3a   :  { %1276 = vsyncadd [#allocation3], 4294965248 }
  0x3b   :  { %1277 = dma.done.wait [#allocation6], 4096  }
  0x3c   :  { %1278 = vsyncadd [#allocation6], 4294963200 }
  0x3d   :  { %1279 = dma.done.wait [#allocation9], 4096  }
  0x3e   :  { %1280 = vsyncadd [#allocation9], 4294963200  ;;  %v129_v0 = vld [vmem:[#allocation5 + $0x78] sm:$0xff]  ;;  %v128_v1 = vld [vmem:[#allocation5 + $0x70] sm:$0xff]  ;;  %s1294_s2 = smov [#allocation12]   ;;  %s1295_s12 = smov [#allocation11]  }
  0x3f   :  { %884 = vmatprep.subr.mxu0 %v129_v0  ;;  %v127_v2 = vld [vmem:[#allocation5 + $0x68] sm:$0xff]  ;;  %v126_v3 = vld [vmem:[#allocation5 + $0x60] sm:$0xff]  ;;  %v125_v5 = vld [vmem:[#allocation5 + $0x58] sm:$0xff]  ;;  %s740_s5 = sshll.u32 %s1294_s2, 4  ;;  %s728_s13 = sshll.u32 %s1295_s12, 4  ;;  %s741_s5 = int_to_ptr.vmem [resolvable:$true] %s740_s5  ;;  %s729_s13 = int_to_ptr.vmem [resolvable:$true] %s728_s13 }
  0x40   :  { %885 = vmatpush3.msra.mxu0 %v129_v0  ;;  %v98_v4 = vld [vmem:[#allocation2] sm:$0xff]  ;;  %v124_v6 = vld [vmem:[#allocation5 + $0x50] sm:$0xff]  ;;  %v123_v7 = vld [vmem:[#allocation5 + $0x48] sm:$0xff]  ;;  %s1195_s16 = scalar_lea.vmem %s741_s5, 2048  ;;  %p1200_p12 = scmp.lt.s32.totalorder %s741_s5, %s741_s5 }
  0x41   :  { %886 = vmatprep.subr.mxu0 %v128_v1  ;;  %916 = vmatprep.mubr.f32.mxu0 %v98_v4  ;;  %v306_v8 = vld [vmem:[#allocation7 + $0x78] sm:$0xff]  ;;  %v305_v9 = vld [vmem:[#allocation7 + $0x70] sm:$0xff]  ;;  %v122_v10 = vld [vmem:[#allocation5 + $0x40] sm:$0xff]  ;;  %p1196_p11 = scmp.ne.s32.totalorder %s741_s5, %s1195_s16  ;;  %p1201_p13 = scmp.lt.s32.totalorder %s1195_s16, %s1195_s16 }
  0x42   :  { %887 = vmatpush3.msra.mxu0 %v128_v1  ;;  %940 = vmatprep.subr.mxu1 %v306_v8  ;;  %v304_v11 = vld [vmem:[#allocation7 + $0x68] sm:$0xff]  ;;  %v121_v12 = vld [vmem:[#allocation5 + $0x38] sm:$0xff]  ;;  %v303_v13 = vld [vmem:[#allocation7 + $0x60] sm:$0xff] }
  0x43   :  { %888 = vmatprep.subr.mxu0 %v127_v2  ;;  %941 = vmatpush3.msra.mxu1 %v306_v8  ;;  %v120_v14 = vld [vmem:[#allocation5 + $0x30] sm:$0xff]  ;;  %v302_v15 = vld [vmem:[#allocation7 + $0x58] sm:$0xff]  ;;  %v119_v16 = vld [vmem:[#allocation5 + $0x28] sm:$0xff]  ;;  %p1202_p0 = por %p1201_p13, %p1200_p12 }
  0x44   :  { %889 = vmatpush3.msra.mxu0 %v127_v2  ;;  %942 = vmatprep.subr.mxu1 %v305_v9  ;;  %v301_v17 = vld [vmem:[#allocation7 + $0x50] sm:$0xff]  ;;  %v118_v18 = vld [vmem:[#allocation5 + $0x20] sm:$0xff]  ;;  %v300_v19 = vld [vmem:[#allocation7 + $0x48] sm:$0xff] }
  0x45   :  { %890 = vmatprep.subr.mxu0 %v126_v3  ;;  %943 = vmatpush3.msra.mxu1 %v305_v9  ;;  %v117_v20 = vld [vmem:[#allocation5 + $0x18] sm:$0xff]  ;;  %v299_v21 = vld [vmem:[#allocation7 + $0x40] sm:$0xff]  ;;  %v116_v22 = vld [vmem:[#allocation5 + $0x10] sm:$0xff]  ;;  %p1203_p1 = pnand %p1202_p0, %p1196_p11 }
  0x46   :  { %891 = vmatpush3.msra.mxu0 %v126_v3  ;;  %944 = vmatprep.subr.mxu1 %v304_v11  ;;  %v298_v23 = vld [vmem:[#allocation7 + $0x38] sm:$0xff]  ;;  %v115_v24 = vld [vmem:[#allocation5 + $0x8] sm:$0xff]  ;;  %v297_v25 = vld [vmem:[#allocation7 + $0x30] sm:$0xff] }
  0x47   :  { %892 = vmatprep.subr.mxu0 %v125_v5  ;;  %945 = vmatpush3.msra.mxu1 %v304_v11  ;;  %v114_v26 = vld [vmem:[#allocation5] sm:$0xff]  ;;  %v296_v27 = vld [vmem:[#allocation7 + $0x28] sm:$0xff]  ;;  %v100_v30 = vld [vmem:[#allocation2 + $0x10] sm:$0xff] }
  0x48   :  { %893 = vmatpush3.msra.mxu0 %v125_v5  ;;  %946 = vmatprep.subr.mxu1 %v303_v13  ;;  %v99_v28 = vld [vmem:[#allocation2 + $0x8] sm:$0xff]  ;;  %v295_v29 = vld [vmem:[#allocation7 + $0x20] sm:$0xff]  ;;  %v294_v31 = vld [vmem:[#allocation7 + $0x18] sm:$0xff] }
  0x49   :  { %894 = vmatprep.subr.mxu0 %v124_v6  ;;  %947 = vmatpush3.msra.mxu1 %v303_v13  ;;  %v101_v32 = vld [vmem:[#allocation2 + $0x18] sm:$0xff]  ;;  %v293_v33 = vld [vmem:[#allocation7 + $0x10] sm:$0xff]  ;;  %v102_v34 = vld [vmem:[#allocation2 + $0x20] sm:$0xff] }
  0x4a   :  { %895 = vmatpush3.msra.mxu0 %v124_v6  ;;  %948 = vmatprep.subr.mxu1 %v302_v15  ;;  %v103_v35 = vld [vmem:[#allocation2 + $0x28] sm:$0xff]  ;;  %v104_v36 = vld [vmem:[#allocation2 + $0x30] sm:$0xff]  ;;  %v105_v37 = vld [vmem:[#allocation2 + $0x38] sm:$0xff] }
  0x4b   :  { %896 = vmatprep.subr.mxu0 %v123_v7  ;;  %949 = vmatpush3.msra.mxu1 %v302_v15  ;;  %v106_v38 = vld [vmem:[#allocation2 + $0x40] sm:$0xff]  ;;  %v107_v39 = vld [vmem:[#allocation2 + $0x48] sm:$0xff]  ;;  %v108_v40 = vld [vmem:[#allocation2 + $0x50] sm:$0xff] }
  0x4c   :  { %897 = vmatpush3.msra.mxu0 %v123_v7  ;;  %950 = vmatprep.subr.mxu1 %v301_v17  ;;  %v109_v41 = vld [vmem:[#allocation2 + $0x58] sm:$0xff]  ;;  %v110_v42 = vld [vmem:[#allocation2 + $0x60] sm:$0xff]  ;;  %v111_v43 = vld [vmem:[#allocation2 + $0x68] sm:$0xff] }
  0x4d   :  { %898 = vmatprep.subr.mxu0 %v122_v10  ;;  %951 = vmatpush3.msra.mxu1 %v301_v17  ;;  %v112_v44 = vld [vmem:[#allocation2 + $0x70] sm:$0xff]  ;;  %v113_v45 = vld [vmem:[#allocation2 + $0x78] sm:$0xff]  ;;  %v292_v46 = vld [vmem:[#allocation7 + $0x8] sm:$0xff] }
  0x4e   :  { %899 = vmatpush3.msra.mxu0 %v122_v10  ;;  %952 = vmatprep.subr.mxu1 %v300_v19  ;;  %v291_v47 = vld [vmem:[#allocation7] sm:$0xff]  ;;  %v483_v48 = vld [vmem:[#allocation8 + $0x78] sm:$0xff]  ;;  %v482_v49 = vld [vmem:[#allocation8 + $0x70] sm:$0xff] }
  0x4f   :  { %900 = vmatprep.subr.mxu0 %v121_v12  ;;  %953 = vmatpush3.msra.mxu1 %v300_v19  ;;  %v481_v50 = vld [vmem:[#allocation8 + $0x68] sm:$0xff]  ;;  %v480_v51 = vld [vmem:[#allocation8 + $0x60] sm:$0xff]  ;;  %v479_v52 = vld [vmem:[#allocation8 + $0x58] sm:$0xff] }
  0x50   :  { %901 = vmatpush3.msra.mxu0 %v121_v12  ;;  %954 = vmatprep.subr.mxu1 %v299_v21  ;;  %v1378_v53 = vld [vmem:[#allocation8 + $0x50] sm:$0xff]  ;;  %v1380_v54 = vld [vmem:[#allocation8 + $0x48] sm:$0xff]  ;;  %v1384_v55 = vld [vmem:[#allocation8 + $0x40] sm:$0xff] }
  0x51   :  { %902 = vmatprep.subr.mxu0 %v120_v14  ;;  %955 = vmatpush3.msra.mxu1 %v299_v21  ;;  %v1388_v56 = vld [vmem:[#allocation8 + $0x38] sm:$0xff]  ;;  %v1392_v57 = vld [vmem:[#allocation8 + $0x30] sm:$0xff]  ;;  %v1396_v58 = vld [vmem:[#allocation8 + $0x28] sm:$0xff] }
  0x52   :  { %903 = vmatpush3.msra.mxu0 %v120_v14  ;;  %956 = vmatprep.subr.mxu1 %v298_v23  ;;  %v1400_v59 = vld [vmem:[#allocation8 + $0x20] sm:$0xff]  ;;  %v1404_v60 = vld [vmem:[#allocation8 + $0x18] sm:$0xff]  ;;  %v1408_v61 = vld [vmem:[#allocation8 + $0x10] sm:$0xff] }
  0x53   :  { %904 = vmatprep.subr.mxu0 %v119_v16  ;;  %957 = vmatpush3.msra.mxu1 %v298_v23  ;;  %v1412_v62 = vld [vmem:[#allocation8 + $0x8] sm:$0xff]  ;;  %v468_v15 = vld [vmem:[#allocation8] sm:$0xff] }
  0x54   :  { %905 = vmatpush3.msra.mxu0 %v119_v16  ;;  %958 = vmatprep.subr.mxu1 %v297_v25 }
  0x55   :  { %906 = vmatprep.subr.mxu0 %v118_v18  ;;  %959 = vmatpush3.msra.mxu1 %v297_v25 }
  0x56   :  { %907 = vmatpush3.msra.mxu0 %v118_v18  ;;  %960 = vmatprep.subr.mxu1 %v296_v27 }
  0x57   :  { %908 = vmatprep.subr.mxu0 %v117_v20  ;;  %961 = vmatpush3.msra.mxu1 %v296_v27 }
  0x58   :  { %909 = vmatpush3.msra.mxu0 %v117_v20  ;;  %962 = vmatprep.subr.mxu1 %v295_v29 }
  0x59   :  { %910 = vmatprep.subr.mxu0 %v116_v22  ;;  %963 = vmatpush3.msra.mxu1 %v295_v29 }
  0x5a   :  { %911 = vmatpush3.msra.mxu0 %v116_v22  ;;  %964 = vmatprep.subr.mxu1 %v294_v31 }
  0x5b   :  { %912 = vmatprep.subr.mxu0 %v115_v24  ;;  %965 = vmatpush3.msra.mxu1 %v294_v31 }
  0x5c   :  { %913 = vmatpush3.msra.mxu0 %v115_v24  ;;  %966 = vmatprep.subr.mxu1 %v293_v33 }
  0x5d   :  { %914 = vmatprep.subr.mxu0 %v114_v26  ;;  %967 = vmatpush3.msra.mxu1 %v293_v33 }
  0x5e   :  { %915 = vmatpush3.msra.mxu0 %v114_v26  ;;  %968 = vmatprep.subr.mxu1 %v292_v46 }
  0x5f   :  { %917 = vmatmul.mubr.f32.vlgmr.msra.gmra.mxu0 %v99_v28  ;;  %969 = vmatpush3.msra.mxu1 %v292_v46 }
  0x60   :  { %919 = vmatprep.mubr.f32.mxu0 %v100_v30  ;;  %970 = vmatprep.subr.mxu1 %v291_v47 }
  0x61   :  { %971 = vmatpush3.msra.mxu1 %v291_v47  ;;  %996 = vmatprep.subr.mxu0 %v483_v48 }
  0x62   :  { %1052 = vmatprep.subr.mxu1 %v483_v48  ;;  %997 = vmatpush3.msra.mxu0 %v483_v48 }
  0x63   :  { %920 = vmatmul.mubr.f32.gmra.mxu0 %v101_v32  ;;  %998 = vmatprep.subr.mxu0 %v482_v49 }
  0x64   :  { %922 = vmatprep.mubr.f32.mxu0 %v102_v34  ;;  %999 = vmatpush3.msra.mxu0 %v482_v49 }
  0x65   :  { %1000 = vmatprep.subr.mxu0 %v481_v50 }
  0x66   :  { %1001 = vmatpush3.msra.mxu0 %v481_v50 }
  0x67   :  { %923 = vmatmul.mubr.f32.gmra.mxu0 %v103_v35  ;;  %1002 = vmatprep.subr.mxu0 %v480_v51 }
  0x68   :  { %925 = vmatprep.mubr.f32.mxu0 %v104_v36  ;;  %1003 = vmatpush3.msra.mxu0 %v480_v51 }
  0x69   :  { %1004 = vmatprep.subr.mxu0 %v479_v52 }
  0x6a   :  { %1005 = vmatpush3.msra.mxu0 %v479_v52 }
  0x6b   :  { %926 = vmatmul.mubr.f32.gmra.mxu0 %v105_v37  ;;  %1006 = vmatprep.subr.mxu0 %v1378_v53 }
  0x6c   :  { %928 = vmatprep.mubr.f32.mxu0 %v106_v38  ;;  %1007 = vmatpush3.msra.mxu0 %v1378_v53 }
  0x6d   :  { %1008 = vmatprep.subr.mxu0 %v1380_v54 }
  0x6e   :  { %1009 = vmatpush3.msra.mxu0 %v1380_v54 }
  0x6f   :  { %929 = vmatmul.mubr.f32.gmra.mxu0 %v107_v39  ;;  %1010 = vmatprep.subr.mxu0 %v1384_v55 }
  0x70   :  { %931 = vmatprep.mubr.f32.mxu0 %v108_v40  ;;  %1011 = vmatpush3.msra.mxu0 %v1384_v55 }
  0x71   :  { %1012 = vmatprep.subr.mxu0 %v1388_v56 }
  0x72   :  { %1013 = vmatpush3.msra.mxu0 %v1388_v56 }
  0x73   :  { %932 = vmatmul.mubr.f32.gmra.mxu0 %v109_v41  ;;  %1014 = vmatprep.subr.mxu0 %v1392_v57 }
  0x74   :  { %934 = vmatprep.mubr.f32.mxu0 %v110_v42  ;;  %1015 = vmatpush3.msra.mxu0 %v1392_v57 }
  0x75   :  { %1016 = vmatprep.subr.mxu0 %v1396_v58 }
  0x76   :  { %1017 = vmatpush3.msra.mxu0 %v1396_v58 }
  0x77   :  { %935 = vmatmul.mubr.f32.gmra.mxu0 %v111_v43  ;;  %1018 = vmatprep.subr.mxu0 %v1400_v59 }
  0x78   :  { %937 = vmatprep.mubr.f32.mxu0 %v112_v44  ;;  %1019 = vmatpush3.msra.mxu0 %v1400_v59 }
  0x79   :  { %1020 = vmatprep.subr.mxu0 %v1404_v60 }
  0x7a   :  { %1021 = vmatpush3.msra.mxu0 %v1404_v60 }
  0x7b   :  { %938 = vmatmul.mubr.f32.gmra.mxu0 %v113_v45  ;;  %1022 = vmatprep.subr.mxu0 %v1408_v61 }
  0x7c   :  { %1023 = vmatpush3.msra.mxu0 %v1408_v61 }
  0x7d   :  { %1024 = vmatprep.subr.mxu0 %v1412_v62 }
  0x7e   :  { %1025 = vmatpush3.msra.mxu0 %v1412_v62 }
  0x7f   :  { %1026 = vmatprep.subr.mxu0 %v468_v15 }
  0x80   :  { %1027 = vmatpush3.msra.mxu0 %v468_v15 }
 0x11f   :  { %v918_v63 = vpop.f32.mrf.mxu0 }
 0x120   :  { %276 = vst [vmem:[#allocation11 + $0x8] sm:$0xff] %v918_v63 }
 0x121   :  { %v196_v0 = vpop.f32.mrf.mxu0 }
 0x122   :  { %275 = vst [vmem:[#allocation11] sm:$0xff] %v196_v0  ;;  %972 = vmatprep.mubr.f32.mxu1 %v196_v0 }
 0x123   :  { %v921_v1 = vpop.f32.mrf.mxu0  ;;  %973 = vmatmul.mubr.f32.vlgmr.msra.gmra.mxu1 %v918_v63 }
 0x124   :  { %278 = vst [vmem:[#allocation11 + $0x18] sm:$0xff] %v921_v1  ;;  %1068 = vmatpush3.msra.mxu1 %v483_v48 }
 0x125   :  { %v206_v2 = vpop.f32.mrf.mxu0  ;;  %1053 = vmatprep.subr.mxu1 %v482_v49 }
 0x126   :  { %277 = vst [vmem:[#allocation11 + $0x10] sm:$0xff] %v206_v2  ;;  %975 = vmatprep.mubr.f32.mxu1 %v206_v2  ;;  %1069 = vmatpush3.msra.mxu1 %v482_v49 }
 0x127   :  { %v924_v3 = vpop.f32.mrf.mxu0  ;;  %976 = vmatmul.mubr.f32.gmra.mxu1 %v921_v1  ;;  %1054 = vmatprep.subr.mxu1 %v481_v50 }
 0x128   :  { %280 = vst [vmem:[#allocation11 + $0x28] sm:$0xff] %v924_v3  ;;  %1070 = vmatpush3.msra.mxu1 %v481_v50 }
 0x129   :  { %v216_v4 = vpop.f32.mrf.mxu0  ;;  %1055 = vmatprep.subr.mxu1 %v480_v51 }
 0x12a   :  { %279 = vst [vmem:[#allocation11 + $0x20] sm:$0xff] %v216_v4  ;;  %978 = vmatprep.mubr.f32.mxu1 %v216_v4  ;;  %1071 = vmatpush3.msra.mxu1 %v480_v51 }
 0x12b   :  { %v927_v5 = vpop.f32.mrf.mxu0  ;;  %979 = vmatmul.mubr.f32.gmra.mxu1 %v924_v3  ;;  %1056 = vmatprep.subr.mxu1 %v479_v52 }
 0x12c   :  { %282 = vst [vmem:[#allocation11 + $0x38] sm:$0xff] %v927_v5  ;;  %1072 = vmatpush3.msra.mxu1 %v479_v52 }
 0x12d   :  { %v226_v6 = vpop.f32.mrf.mxu0  ;;  %1057 = vmatprep.subr.mxu1 %v1378_v53 }
 0x12e   :  { %281 = vst [vmem:[#allocation11 + $0x30] sm:$0xff] %v226_v6  ;;  %981 = vmatprep.mubr.f32.mxu1 %v226_v6  ;;  %1073 = vmatpush3.msra.mxu1 %v1378_v53 }
 0x12f   :  { %v930_v7 = vpop.f32.mrf.mxu0  ;;  %982 = vmatmul.mubr.f32.gmra.mxu1 %v927_v5  ;;  %1058 = vmatprep.subr.mxu1 %v1380_v54 }
 0x130   :  { %284 = vst [vmem:[#allocation11 + $0x48] sm:$0xff] %v930_v7  ;;  %1074 = vmatpush3.msra.mxu1 %v1380_v54 }
 0x131   :  { %v236_v8 = vpop.f32.mrf.mxu0  ;;  %1059 = vmatprep.subr.mxu1 %v1384_v55 }
 0x132   :  { %283 = vst [vmem:[#allocation11 + $0x40] sm:$0xff] %v236_v8  ;;  %984 = vmatprep.mubr.f32.mxu1 %v236_v8  ;;  %1075 = vmatpush3.msra.mxu1 %v1384_v55 }
 0x133   :  { %v933_v9 = vpop.f32.mrf.mxu0  ;;  %985 = vmatmul.mubr.f32.gmra.mxu1 %v930_v7  ;;  %1060 = vmatprep.subr.mxu1 %v1388_v56 }
 0x134   :  { %286 = vst [vmem:[#allocation11 + $0x58] sm:$0xff] %v933_v9  ;;  %1076 = vmatpush3.msra.mxu1 %v1388_v56 }
 0x135   :  { %v246_v10 = vpop.f32.mrf.mxu0  ;;  %1061 = vmatprep.subr.mxu1 %v1392_v57 }
 0x136   :  { %285 = vst [vmem:[#allocation11 + $0x50] sm:$0xff] %v246_v10  ;;  %987 = vmatprep.mubr.f32.mxu1 %v246_v10  ;;  %1077 = vmatpush3.msra.mxu1 %v1392_v57 }
 0x137   :  { %v936_v11 = vpop.f32.mrf.mxu0  ;;  %988 = vmatmul.mubr.f32.gmra.mxu1 %v933_v9  ;;  %1062 = vmatprep.subr.mxu1 %v1396_v58 }
 0x138   :  { %288 = vst [vmem:[#allocation11 + $0x68] sm:$0xff] %v936_v11  ;;  %1078 = vmatpush3.msra.mxu1 %v1396_v58 }
 0x139   :  { %v256_v12 = vpop.f32.mrf.mxu0  ;;  %1063 = vmatprep.subr.mxu1 %v1400_v59 }
 0x13a   :  { %287 = vst [vmem:[#allocation11 + $0x60] sm:$0xff] %v256_v12  ;;  %990 = vmatprep.mubr.f32.mxu1 %v256_v12  ;;  %1079 = vmatpush3.msra.mxu1 %v1400_v59 }
 0x13b   :  { %v939_v13 = vpop.f32.mrf.mxu0  ;;  %991 = vmatmul.mubr.f32.gmra.mxu1 %v936_v11  ;;  %1064 = vmatprep.subr.mxu1 %v1404_v60 }
 0x13c   :  { %290 = vst [vmem:[#allocation11 + $0x78] sm:$0xff] %v939_v13  ;;  %1080 = vmatpush3.msra.mxu1 %v1404_v60 }
 0x13d   :  { %v266_v14 = vpop.f32.mrf.mxu0  ;;  %1065 = vmatprep.subr.mxu1 %v1408_v61 }
 0x13e   :  { %289 = vst [vmem:[#allocation11 + $0x70] sm:$0xff] %v266_v14  ;;  %993 = vmatprep.mubr.f32.mxu1 %v266_v14  ;;  %1081 = vmatpush3.msra.mxu1 %v1408_v61 }
 0x13f   :  { %994 = vmatmul.mubr.f32.gmra.mxu1 %v939_v13  ;;  %1066 = vmatprep.subr.mxu1 %v1412_v62 }
 0x140   :  { %1082 = vmatpush3.msra.mxu1 %v1412_v62 }
 0x141   :  { %1067 = vmatprep.subr.mxu1 %v468_v15 }
 0x142   :  { %1083 = vmatpush3.msra.mxu1 %v468_v15 }
 0x1e3   :  { %v974_v16 = vpop.f32.mrf.mxu1 }
 0x1e4   :  { %453 = vst [vmem:[#allocation12 + $0x8] sm:$0xff] %v974_v16 }
 0x1e5   :  { %v373_v17 = vpop.f32.mrf.mxu1 }
 0x1e6   :  { %452 = vst [vmem:[#allocation12] sm:$0xff] %v373_v17  ;;  %1028 = vmatprep.mubr.f32.mxu0 %v373_v17 }
 0x1e7   :  { %v977_v18 = vpop.f32.mrf.mxu1  ;;  %1029 = vmatmul.mubr.f32.vlgmr.msra.gmra.mxu0 %v974_v16 }
 0x1e8   :  { %455 = vst [vmem:[#allocation12 + $0x18] sm:$0xff] %v977_v18 }
 0x1e9   :  { %v383_v19 = vpop.f32.mrf.mxu1 }
 0x1ea   :  { %454 = vst [vmem:[#allocation12 + $0x10] sm:$0xff] %v383_v19  ;;  %1031 = vmatprep.mubr.f32.mxu0 %v383_v19 }
 0x1eb   :  { %v980_v20 = vpop.f32.mrf.mxu1  ;;  %1032 = vmatmul.mubr.f32.gmra.mxu0 %v977_v18 }
 0x1ec   :  { %457 = vst [vmem:[#allocation12 + $0x28] sm:$0xff] %v980_v20 }
 0x1ed   :  { %v393_v21 = vpop.f32.mrf.mxu1 }
 0x1ee   :  { %456 = vst [vmem:[#allocation12 + $0x20] sm:$0xff] %v393_v21  ;;  %1034 = vmatprep.mubr.f32.mxu0 %v393_v21 }
 0x1ef   :  { %v983_v22 = vpop.f32.mrf.mxu1  ;;  %1035 = vmatmul.mubr.f32.gmra.mxu0 %v980_v20 }
 0x1f0   :  { %459 = vst [vmem:[#allocation12 + $0x38] sm:$0xff] %v983_v22 }
 0x1f1   :  { %v403_v23 = vpop.f32.mrf.mxu1 }
 0x1f2   :  { %458 = vst [vmem:[#allocation12 + $0x30] sm:$0xff] %v403_v23  ;;  %1037 = vmatprep.mubr.f32.mxu0 %v403_v23 }
 0x1f3   :  { %v986_v24 = vpop.f32.mrf.mxu1  ;;  %1038 = vmatmul.mubr.f32.gmra.mxu0 %v983_v22 }
 0x1f4   :  { %461 = vst [vmem:[#allocation12 + $0x48] sm:$0xff] %v986_v24 }
 0x1f5   :  { %v413_v25 = vpop.f32.mrf.mxu1 }
 0x1f6   :  { %460 = vst [vmem:[#allocation12 + $0x40] sm:$0xff] %v413_v25  ;;  %1040 = vmatprep.mubr.f32.mxu1 %v413_v25 }
 0x1f7   :  { %v989_v26 = vpop.f32.mrf.mxu1  ;;  %1041 = vmatmul.mubr.f32.vlgmr.msra.gmra.mxu1 %v986_v24 }
 0x1f8   :  { %463 = vst [vmem:[#allocation12 + $0x58] sm:$0xff] %v989_v26 }
 0x1f9   :  { %v423_v27 = vpop.f32.mrf.mxu1 }
 0x1fa   :  { %462 = vst [vmem:[#allocation12 + $0x50] sm:$0xff] %v423_v27  ;;  %1043 = vmatprep.mubr.f32.mxu1 %v423_v27 }
 0x1fb   :  { %v992_v28 = vpop.f32.mrf.mxu1  ;;  %1044 = vmatmul.mubr.f32.gmra.mxu1 %v989_v26 }
 0x1fc   :  { %465 = vst [vmem:[#allocation12 + $0x68] sm:$0xff] %v992_v28 }
 0x1fd   :  { %v433_v29 = vpop.f32.mrf.mxu1 }
 0x1fe   :  { %464 = vst [vmem:[#allocation12 + $0x60] sm:$0xff] %v433_v29  ;;  %1046 = vmatprep.mubr.f32.mxu1 %v433_v29 }
 0x1ff   :  { %v995_v30 = vpop.f32.mrf.mxu1  ;;  %1047 = vmatmul.mubr.f32.gmra.mxu1 %v992_v28 }
 0x200   :  { %467 = vst [vmem:[#allocation12 + $0x78] sm:$0xff] %v995_v30 }
 0x201   :  { %v443_v31 = vpop.f32.mrf.mxu1 }
 0x202   :  { %466 = vst [vmem:[#allocation12 + $0x70] sm:$0xff] %v443_v31  ;;  %1049 = vmatprep.mubr.f32.mxu1 %v443_v31 }
 0x203   :  { %1050 = vmatmul.mubr.f32.gmra.mxu1 %v995_v30 }
 0x204   :  { %1206 = shalt.err (!%p1203_p1)
}
 0x205   :  { %746 = dma.vmem_to_hbm [thread:$0]  %s741_s5, 2048, %s1487_s7, [#allocation13], %s1289_s14, %s1289_s14, %s1290_s15  }
 0x206   :  { %s1215_s19 = scalar_lea.vmem %s729_s13, 2048  ;;  %p1220_p3 = scmp.lt.s32.totalorder %s729_s13, %s729_s13 }
 0x207   :  { %p1216_p2 = scmp.ne.s32.totalorder %s729_s13, %s1215_s19  ;;  %p1221_p4 = scmp.lt.s32.totalorder %s1215_s19, %s1215_s19 }
 0x209   :  { %p1222_p5 = por %p1221_p4, %p1220_p3 }
 0x20b   :  { %p1223_p6 = pnand %p1222_p5, %p1216_p2 }
 0x20d   :  { %1226 = shalt.err (!%p1223_p6)
}
 0x20e   :  { %734 = dma.vmem_to_hbm [thread:$0]  %s729_s13, 2048, %s1486_s6, [#allocation4], %s1289_s14, %s1289_s14, %s1290_s15   ;;  %v653_v35 = vld [vmem:[#allocation10 + $0x8] sm:$0xff]  ;;  %v652_v37 = vld [vmem:[#allocation10] sm:$0xff]  ;;  %v655_v43 = vld [vmem:[#allocation10 + $0x18] sm:$0xff] }
 0x20f   :  { %v1453_v32 = vld [vmem:[%s1484_s4] ss:$0 sm:$0xff]  ;;  %v654_v45 = vld [vmem:[#allocation10 + $0x10] sm:$0xff]  ;;  %v657_v53 = vld [vmem:[#allocation10 + $0x28] sm:$0xff]  ;;  %s1296_s4 = smov [#allocation14]  }
 0x210   :  { %v656_v55 = vld [vmem:[#allocation10 + $0x20] sm:$0xff]  ;;  %v659_v1 = vld [vmem:[#allocation10 + $0x38] sm:$0xff]  ;;  %v658_v3 = vld [vmem:[#allocation10 + $0x30] sm:$0xff]  ;;  %s752_s6 = sshll.u32 %s1296_s4, 4  ;;  %s753_s6 = int_to_ptr.vmem [resolvable:$true] %s752_s6 }
 0x211   :  { %v661_v13 = vld [vmem:[#allocation10 + $0x48] sm:$0xff]  ;;  %v660_v15 = vld [vmem:[#allocation10 + $0x40] sm:$0xff]  ;;  %v663_v25 = vld [vmem:[#allocation10 + $0x58] sm:$0xff]  ;;  %s1235_s7 = scalar_lea.vmem %s753_s6, 2048  ;;  %p1240_p8 = scmp.lt.s32.totalorder %s753_s6, %s753_s6 }
 0x212   :  { %v662_v27 = vld [vmem:[#allocation10 + $0x50] sm:$0xff]  ;;  %p1236_p7 = scmp.ne.s32.totalorder %s753_s6, %s1235_s7  ;;  %p1241_p9 = scmp.lt.s32.totalorder %s1235_s7, %s1235_s7 }
 0x214   :  { %p1242_p10 = por %p1241_p9, %p1240_p8 }
 0x216   :  { %p1243_p11 = pnand %p1242_p10, %p1236_p7 }
 0x2a7   :  { %v1030_v33 = vpop.f32.mrf.mxu0 }
 0x2a8   :  { %v563_v34 = vadd.f32 %v1030_v33, %v1453_v32 }
 0x2a9   :  { %v557_v36 = vpop.f32.mrf.mxu0 }
 0x2aa   :  { %637 = vst [vmem:[#allocation14 + $0x8] sm:$0xff] %v563_v34  ;;  %v558_v38 = vadd.f32 %v1453_v32, %v557_v36  ;;  %v669_v40 = vsub.f32 %v563_v34, %v653_v35 }
 0x2ab   :  { %v1033_v39 = vpop.f32.mrf.mxu0 }
 0x2ac   :  { %636 = vst [vmem:[#allocation14] sm:$0xff] %v558_v38  ;;  %v668_v41 = vsub.f32 %v558_v38, %v652_v37  ;;  %v573_v42 = vadd.f32 %v1033_v39, %v1453_v32  ;;  %v685_v50 = vmul.f32 %v669_v40, %v669_v40  ;;  %v665_v38 = vld [vmem:[#allocation10 + $0x68] sm:$0xff]  ;;  %v664_v40 = vld [vmem:[#allocation10 + $0x60] sm:$0xff] }
 0x2ad   :  { %v567_v44 = vpop.f32.mrf.mxu0 }
 0x2ae   :  { %v684_v46 = vmul.f32 %v668_v41, %v668_v41  ;;  %639 = vst [vmem:[#allocation14 + $0x18] sm:$0xff] %v573_v42  ;;  %v568_v47 = vadd.f32 %v1453_v32, %v567_v44  ;;  %v671_v48 = vsub.f32 %v573_v42, %v655_v43 }
 0x2af   :  { %v1036_v49 = vpop.f32.mrf.mxu0 }
 0x2b0   :  { %638 = vst [vmem:[#allocation14 + $0x10] sm:$0xff] %v568_v47  ;;  %v670_v51 = vsub.f32 %v568_v47, %v654_v45  ;;  %v583_v52 = vadd.f32 %v1036_v49, %v1453_v32  ;;  %v700_v56 = vadd.f32 %v685_v50, %v684_v46  ;;  %v687_v59 = vmul.f32 %v671_v48, %v671_v48  ;;  %v667_v50 = vld [vmem:[#allocation10 + $0x78] sm:$0xff] }
 0x2b1   :  { %v577_v54 = vpop.f32.mrf.mxu0 }
 0x2b2   :  { %v686_v57 = vmul.f32 %v670_v51, %v670_v51  ;;  %641 = vst [vmem:[#allocation14 + $0x28] sm:$0xff] %v583_v52  ;;  %v578_v58 = vadd.f32 %v1453_v32, %v577_v54  ;;  %v673_v62 = vsub.f32 %v583_v52, %v657_v53  ;;  %v666_v52 = vld [vmem:[#allocation10 + $0x70] sm:$0xff] }
 0x2b3   :  { %v1039_v60 = vpop.f32.mrf.mxu0 }
 0x2b4   :  { %v701_v61 = vadd.f32 %v700_v56, %v686_v57  ;;  %640 = vst [vmem:[#allocation14 + $0x20] sm:$0xff] %v578_v58  ;;  %v672_v63 = vsub.f32 %v578_v58, %v656_v55  ;;  %v593_v0 = vadd.f32 %v1039_v60, %v1453_v32  ;;  %v689_v9 = vmul.f32 %v673_v62, %v673_v62 }
 0x2b5   :  { %v587_v2 = vpop.f32.mrf.mxu0 }
 0x2b6   :  { %v688_v4 = vmul.f32 %v672_v63, %v672_v63  ;;  %v702_v5 = vadd.f32 %v701_v61, %v687_v59  ;;  %643 = vst [vmem:[#allocation14 + $0x38] sm:$0xff] %v593_v0  ;;  %v588_v6 = vadd.f32 %v1453_v32, %v587_v2  ;;  %v675_v7 = vsub.f32 %v593_v0, %v659_v1 }
 0x2b7   :  { %v1042_v8 = vpop.f32.mrf.mxu1 }
 0x2b8   :  { %v703_v10 = vadd.f32 %v702_v5, %v688_v4  ;;  %642 = vst [vmem:[#allocation14 + $0x30] sm:$0xff] %v588_v6  ;;  %v674_v11 = vsub.f32 %v588_v6, %v658_v3  ;;  %v603_v12 = vadd.f32 %v1042_v8, %v1453_v32  ;;  %v691_v19 = vmul.f32 %v675_v7, %v675_v7 }
 0x2b9   :  { %v597_v14 = vpop.f32.mrf.mxu1 }
 0x2ba   :  { %v690_v16 = vmul.f32 %v674_v11, %v674_v11  ;;  %v704_v17 = vadd.f32 %v703_v10, %v689_v9  ;;  %645 = vst [vmem:[#allocation14 + $0x48] sm:$0xff] %v603_v12  ;;  %v598_v18 = vadd.f32 %v1453_v32, %v597_v14  ;;  %v677_v22 = vsub.f32 %v603_v12, %v661_v13 }
 0x2bb   :  { %v1045_v20 = vpop.f32.mrf.mxu1 }
 0x2bc   :  { %v705_v21 = vadd.f32 %v704_v17, %v690_v16  ;;  %644 = vst [vmem:[#allocation14 + $0x40] sm:$0xff] %v598_v18  ;;  %v676_v23 = vsub.f32 %v598_v18, %v660_v15  ;;  %v613_v24 = vadd.f32 %v1045_v20, %v1453_v32  ;;  %v693_v34 = vmul.f32 %v677_v22, %v677_v22 }
 0x2bd   :  { %v607_v26 = vpop.f32.mrf.mxu1 }
 0x2be   :  { %v692_v28 = vmul.f32 %v676_v23, %v676_v23  ;;  %v706_v29 = vadd.f32 %v705_v21, %v691_v19  ;;  %647 = vst [vmem:[#allocation14 + $0x58] sm:$0xff] %v613_v24  ;;  %v608_v30 = vadd.f32 %v1453_v32, %v607_v26  ;;  %v679_v31 = vsub.f32 %v613_v24, %v663_v25 }
 0x2bf   :  { %v1048_v33 = vpop.f32.mrf.mxu1 }
 0x2c0   :  { %v707_v35 = vadd.f32 %v706_v29, %v692_v28  ;;  %646 = vst [vmem:[#allocation14 + $0x50] sm:$0xff] %v608_v30  ;;  %v678_v36 = vsub.f32 %v608_v30, %v662_v27  ;;  %v623_v37 = vadd.f32 %v1048_v33, %v1453_v32  ;;  %v695_v44 = vmul.f32 %v679_v31, %v679_v31 }
 0x2c1   :  { %v617_v39 = vpop.f32.mrf.mxu1 }
 0x2c2   :  { %v694_v41 = vmul.f32 %v678_v36, %v678_v36  ;;  %v708_v42 = vadd.f32 %v707_v35, %v693_v34  ;;  %649 = vst [vmem:[#allocation14 + $0x68] sm:$0xff] %v623_v37  ;;  %v618_v43 = vadd.f32 %v1453_v32, %v617_v39  ;;  %v681_v47 = vsub.f32 %v623_v37, %v665_v38 }
 0x2c3   :  { %v1051_v45 = vpop.f32.mrf.mxu1 }
 0x2c4   :  { %v709_v46 = vadd.f32 %v708_v42, %v694_v41  ;;  %648 = vst [vmem:[#allocation14 + $0x60] sm:$0xff] %v618_v43  ;;  %v680_v48 = vsub.f32 %v618_v43, %v664_v40  ;;  %v633_v49 = vadd.f32 %v1051_v45, %v1453_v32  ;;  %v697_v56 = vmul.f32 %v681_v47, %v681_v47 }
 0x2c5   :  { %v627_v51 = vpop.f32.mrf.mxu1 }
 0x2c6   :  { %v696_v53 = vmul.f32 %v680_v48, %v680_v48  ;;  %v710_v54 = vadd.f32 %v709_v46, %v695_v44  ;;  %651 = vst [vmem:[#allocation14 + $0x78] sm:$0xff] %v633_v49  ;;  %v628_v55 = vadd.f32 %v1453_v32, %v627_v51  ;;  %v683_v58 = vsub.f32 %v633_v49, %v667_v50 }
 0x2c8   :  { %v711_v57 = vadd.f32 %v710_v54, %v696_v53  ;;  %650 = vst [vmem:[#allocation14 + $0x70] sm:$0xff] %v628_v55  ;;  %v682_v59 = vsub.f32 %v628_v55, %v666_v52 }
 0x2c9   :  { %1246 = shalt.err (!%p1243_p11)
}
 0x2ca   :  { %758 = dma.vmem_to_hbm [thread:$0]  %s753_s6, 2048, %s1488_s8, [#allocation13], %s1289_s14, %s1289_s14, %s1290_s15   ;;  %v698_v32 = vmul.f32 %v682_v59, %v682_v59  ;;  %v712_v60 = vadd.f32 %v711_v57, %v697_v56  ;;  %v699_v61 = vmul.f32 %v683_v58, %v683_v58 }
 0x2cb   :  { %s1297_s25 = smov [#allocation15]  }
 0x2cc   :  { %v713_v62 = vadd.f32 %v712_v60, %v698_v32  ;;  %s765_s26 = sshll.u32 %s1297_s25, 4  ;;  %s766_s26 = int_to_ptr.vmem [resolvable:$true] %s765_s26 }
 0x2cd   :  { %s1255_s3 = scalar_lea.vmem %s766_s26, 16  ;;  %s1259_s27 = scalar_lea.vmem %s766_s26, 32 }
 0x2ce   :  { %v714_v63 = vadd.f32 %v713_v62, %v699_v61  ;;  %p1256_p12 = scmp.ne.s32.totalorder %s766_s26, %s1255_s3  ;;  %p1260_p13 = scmp.lt.s32.totalorder %s766_s26, %s766_s26 }
 0x2cf   :  { %p1261_p0 = scmp.lt.s32.totalorder %s1259_s27, %s1255_s3 }
 0x2d0   :  { %v715_v0 = vrot.slane %v714_v63, 4 }
 0x2d1   :  { %p1262_p1 = por %p1261_p0, %p1260_p13 }
 0x2d2   :  { %v716_v1 = vadd.f32 %v715_v0, %v714_v63 }
 0x2d3   :  { %p1263_p2 = pnand %p1262_p1, %p1256_p12 }
 0x2d4   :  { %v717_v2 = vrot.slane %v716_v1, 2 }
 0x2d6   :  { %v718_v3 = vadd.f32 %v717_v2, %v716_v1 }
 0x2d8   :  { %v719_v4 = vrot.slane %v718_v3, 1 }
 0x2da   :  { %v720_v5 = vadd.f32 %v719_v4, %v718_v3 }
 0x2dc   :  { %v721_v6 = vmul.f32 0.00390625, %v720_v5 }
 0x2de   :  { %722 = vst [vmem:[#allocation15] sm:$0x1] %v721_v6 }
 0x2df   :  { %1266 = shalt.err (!%p1263_p2)
}
 0x2e0   :  { %768 = dma.vmem_to_hbm [thread:$0]  %s766_s26, 16, %s1489_s9, [#allocation16]  }
 0x2e1   :  { %1281 = dma.done.wait [#allocation4], 2048  }
 0x2e2   :  { %1282 = vsyncadd [#allocation4], 4294965248 }
 0x2e3   :  { %1283 = dma.done.wait [#allocation13], 4096  }
 0x2e4   :  { %1284 = vsyncadd [#allocation13], 4294963200 }
 0x2e5   :  { %1285 = dma.done.wait [#allocation16], 16  }
 0x2e6   :  { %1286 = vsyncadd [#allocation16], 4294967280 }
 0x2e7   :  { %781 = vsyncpa [#allocation3], 1 }
 0x2e8   :  { %782 = vsyncpa [#allocation6], 1 }
 0x2e9   :  { %783 = vsyncpa [#allocation9], 1 }
 0x2ea   :  { %784 = vsyncpa [#allocation4], 1 }
 0x2eb   :  { %785 = vsyncpa [#allocation13], 1 }
 0x2ec   :  { %786 = vsyncpa [#allocation16], 1 }

</bundles_post_ra>
